<compile_context>
chip_gen: v7x
topology: tpu7x:2x2x1
jax: 0.10.0
libtpu: 0.0.40
codegen_flags: <defaults>
</compile_context>

<pallas_src>
import jax
import jax.numpy as jnp
from jax.experimental import pallas as pl
from jax.experimental.pallas import tpu as pltpu

_NEG = -1.0e30  # finite "-inf" sentinel: exp(_NEG - finite) underflows to 0 without NaN hazards


# ----------------------------------------------------------------------------
# Tiling helpers
# ----------------------------------------------------------------------------
def _pick_tile(n, target, quantum):
    """Largest tile <= target that is a multiple of `quantum` and divides n (else full n)."""
    if n <= target:
        return n
    t = (target // quantum) * quantum
    while t >= quantum:
        if n % t == 0:
            return t
        t -= quantum
    return n


def _agnn_tiles(n, tq_target=512, tk_target=1024):
    """AGNN tile sizes. dst quantum 32 (int8 adjacency native tiling); keep >=2 dst tiles so the
    'parallel' dst axis can be sharded across both TensorCores on v7x."""
    tq_cap = tq_target
    if n >= 64:
        tq_cap = min(tq_target, max(32, (n // 2) // 32 * 32))
    tq = _pick_tile(n, tq_cap, 32)
    tk = _pick_tile(n, tk_target, 128)
    return tq, tk


def _block_nonempty(adj_i8, tq, tk):
    """(n//tq * n//tk,) int32 table: 1 iff the adjacency tile has any edge (scalar-prefetched)."""
    n = adj_i8.shape[0]
    nqt, nkt = n // tq, n // tk
    tbl = (adj_i8.reshape(nqt, tq, nkt, tk) != 0).any(axis=(1, 3))
    return tbl.reshape(-1).astype(jnp.int32)


# ----------------------------------------------------------------------------
# AGNNConv: tiled, online-softmax Pallas kernel
# ----------------------------------------------------------------------------
def _make_agnn_kernel(scale, valid_d, fuse_inv_t, bf16_exp):
    """scale = beta/temp (compile-time constant: GraphClassifier uses learn_beta=False)."""

    def kernel(ne_ref, featq_ref, featk_ref, adj_ref, out_ref, qb_sc, m_sc, l_sc, acc_sc):
        i_idx = pl.program_id(0)
        k_idx = pl.program_id(1)

        @pl.when(k_idx == 0)
        def _init():
            # dst tile is constant across the src axis: normalize / fold scale / cast once.
            fq = featq_ref[...]
            nq = fq * jax.lax.rsqrt(
                jnp.maximum(jnp.sum(fq * fq, axis=-1, keepdims=True), 1e-24))
            qb_sc[...] = (nq * scale).astype(jnp.bfloat16)
            m_sc[...] = jnp.full_like(m_sc, _NEG)
            l_sc[...] = jnp.zeros_like(l_sc)
            acc_sc[...] = jnp.zeros_like(acc_sc)

        # Skip all compute for adjacency tiles with no edges (occupancy table in SMEM).
        @pl.when(ne_ref[i_idx * pl.num_programs(1) + k_idx] != 0)
        def _compute():
            fk_bf = featk_ref[...]                          # (tk, Dp) bf16 src features
            fk32 = fk_bf.astype(jnp.float32)
            nk = fk32 * jax.lax.rsqrt(
                jnp.maximum(jnp.sum(fk32 * fk32, axis=-1, keepdims=True), 1e-24))

            # bf16 MXU inputs, f32 accumulation; contracting dim 1 of both (no transpose).
            s = jax.lax.dot_general(qb_sc[...], nk.astype(jnp.bfloat16),
                                    (((1,), (1,)), ((), ())),
                                    preferred_element_type=jnp.float32)   # (tq, tk)

            masked = jnp.where(adj_ref[...] != 0, s, _NEG)  # compare on the packed int8 mask

            # online softmax update
            m_prev = m_sc[...]
            m_new = jnp.maximum(m_prev, jnp.max(masked, axis=-1, keepdims=True))
            alpha = jnp.exp(m_prev - m_new)                 # 0 or exp(<=0), never NaN
            if bf16_exp:                                    # v6e/v7x opt-in (no bf16 EUP on v5e)
                p = jnp.exp((masked - m_new).astype(jnp.bfloat16))
                p_sum = jnp.sum(p.astype(jnp.float32), axis=-1, keepdims=True)
            else:
                p32 = jnp.exp(masked - m_new)
                p = p32.astype(jnp.bfloat16)
                p_sum = jnp.sum(p32, axis=-1, keepdims=True)

            l_sc[...] = alpha * l_sc[...] + p_sum
            acc_sc[...] = alpha * acc_sc[...] + jnp.dot(
                p, fk_bf, preferred_element_type=jnp.float32)
            m_sc[...] = m_new

        @pl.when(k_idx == pl.num_programs(1) - 1)
        def _finalize():
            # zero-in-degree rows (allow_zero_in_degree=True): m stayed at the sentinel.
            keep = m_sc[...] > _NEG * 0.5
            # clamp the denominator before the reciprocal so empty rows never see 0 * inf.
            inv_l = pl.reciprocal(jnp.maximum(l_sc[...], 1e-30), approx=True)
            agg = jnp.where(keep, acc_sc[...] * inv_l, 0.0)
            if fuse_inv_t is None:
                out_ref[...] = agg
            else:
                # fused softmax(out / t1): padded lanes masked to -inf -> exactly 0 after exp.
                lane = jax.lax.broadcasted_iota(jnp.int32, agg.shape, dimension=1)
                z = jnp.where(lane < valid_d, agg * fuse_inv_t, _NEG)
                z = z - jnp.max(z, axis=-1, keepdims=True)
                ez = jnp.exp(z)
                out_ref[...] = ez / jnp.sum(ez, axis=-1, keepdims=True)

    return kernel


def agnn_conv(feat, adj_i8, scale, *, valid_d=None, input_padded=False, output_padded=False,
              fuse_softmax_temp=None, bf16_exp=False, block_nonempty=None,
              tq_target=512, tk_target=1024):
    """AGNNConv forward.  feat: (N, D) f32 (or (N, Dp) if input_padded), adj_i8: (N, N) int8 mask,
    scale: python float = beta / temp (GraphClassifier uses learn_beta=False)."""
    n, d_in = feat.shape
    assert adj_i8.shape == (n, n)
    assert n % 32 == 0, "pad node count to a multiple of 32 (graph_classifier_forward does this)"
    if valid_d is None:
        valid_d = d_in

    if input_padded:
        assert d_in % 128 == 0
        dp = d_in
        feat_q = feat
    else:
        dp = max(128, -(-d_in // 128) * 128)     # lane-dense feature dim
        feat_q = jnp.pad(feat, ((0, 0), (0, dp - d_in))) if dp != d_in else feat
    feat_k = feat_q.astype(jnp.bfloat16)          # dominant HBM stream: cast once, stream bf16

    tq, tk = _agnn_tiles(n, tq_target, tk_target)
    nqt, nkt = n // tq, n // tk
    if block_nonempty is None:
        block_nonempty = _block_nonempty(adj_i8, tq, tk)
    assert block_nonempty.shape == (nqt * nkt,)

    fuse_inv_t = None if fuse_softmax_temp is None else 1.0 / float(fuse_softmax_temp)
    kernel = _make_agnn_kernel(float(scale), valid_d, fuse_inv_t, bf16_exp)

    out = pl.pallas_call(
        kernel,
        out_shape=jax.ShapeDtypeStruct((n, dp), jnp.float32),
        grid_spec=pltpu.PrefetchScalarGridSpec(
            num_scalar_prefetch=1,
            grid=(nqt, nkt),
            in_specs=[
                pl.BlockSpec((tq, dp), lambda i, k, ne: (i, 0)),    # dst features, f32
                pl.BlockSpec((tk, dp), lambda i, k, ne: (k, 0)),    # src features, bf16
                pl.BlockSpec((tq, tk), lambda i, k, ne: (i, k)),    # int8 adjacency tile
            ],
            out_specs=pl.BlockSpec((tq, dp), lambda i, k, ne: (i, 0)),  # resident across src axis
            scratch_shapes=[
                pltpu.VMEM((tq, dp), jnp.bfloat16),   # cached normalized/scaled dst tile
                pltpu.VMEM((tq, 1), jnp.float32),     # running max
                pltpu.VMEM((tq, 1), jnp.float32),     # running denom
                pltpu.VMEM((tq, dp), jnp.float32),    # running numerator
            ],
        ),
        compiler_params=pltpu.CompilerParams(
            dimension_semantics=("parallel", "arbitrary"),
            vmem_limit_bytes=32 * 1024 * 1024),       # v5e's scoped default is only 16 MiB
    )(block_nonempty, feat_q, feat_k, adj_i8)

    if output_padded or dp == valid_d:
        return out
    return out[:, :valid_d]


# ----------------------------------------------------------------------------
# Classifier head (tiled over rows, two-pass BatchNorm):
#   pass A: MarkerWeight -> per-marker sum -> accumulate batch sum / sum-of-squares
#   pass B: BatchNorm1d -> LeakyReLU(0.25) -> softmax(f/t2) @ ref_center
# ----------------------------------------------------------------------------
def _head_stats_kernel(fea_ref, wflat_ref, summat_ref, feas_ref, fraw_ref, ssum_ref, ssq_ref):
    @pl.when(pl.program_id(0) == 0)
    def _init():
        ssum_ref[...] = jnp.zeros_like(ssum_ref)
        ssq_ref[...] = jnp.zeros_like(ssq_ref)

    fea_s = fea_ref[...] * wflat_ref[...]                    # MarkerWeight broadcast
    feas_ref[...] = fea_s
    # f[n, o] = sum_m fea_s[n, m*O + o] via 0/1 selection matmul (no 3-D reshape relayout)
    f_raw = jnp.dot(fea_s, summat_ref[...], preferred_element_type=jnp.float32)
    fraw_ref[...] = f_raw
    # every sublane row of the (8, Op) accumulators carries the same partial sum; row 0 is read back
    ssum_ref[...] += jnp.broadcast_to(jnp.sum(f_raw, axis=0, keepdims=True), ssum_ref.shape)
    ssq_ref[...] += jnp.broadcast_to(jnp.sum(f_raw * f_raw, axis=0, keepdims=True), ssq_ref.shape)


def _make_head_finalize_kernel(inv_t2, slope, valid_o):
    def kernel(fraw_ref, scale_ref, shift_ref, refc_ref, fact_ref, p_ref):
        f_bn = fraw_ref[...] * scale_ref[...] + shift_ref[...]
        f_act = jnp.where(f_bn >= 0.0, f_bn, slope * f_bn)   # LeakyReLU(0.25)
        lane = jax.lax.broadcasted_iota(jnp.int32, f_act.shape, dimension=1)
        valid = lane < valid_o
        f_act = jnp.where(valid, f_act, 0.0)                 # padded lanes stay 0 for downstream AGNN
        fact_ref[...] = f_act
        z = jnp.where(valid, f_act * inv_t2, _NEG)           # sharp softmax over valid lanes only
        z = z - jnp.max(z, axis=-1, keepdims=True)
        ez = jnp.exp(z)
        sm = ez / jnp.sum(ez, axis=-1, keepdims=True)
        p_ref[...] = jnp.dot(sm, refc_ref[...], preferred_element_type=jnp.float32)

    return kernel


def classifier_head(fea_pad, marker_w, ref_center, *, n_real, t2, slope=0.25, bn_eps=1e-5,
                    tn_target=512):
    """fea_pad: (Np, Dfin) with the first marker_dim*output_dim lanes valid (rest zero)."""
    np_, dfin = fea_pad.shape
    m, o = marker_w.shape
    mo = m * o
    c = ref_center.shape[1]
    assert dfin >= mo and np_ % 32 == 0
    op = max(128, -(-o // 128) * 128)
    cp = max(128, -(-c // 128) * 128)

    wflat = jnp.zeros((1, dfin), jnp.float32).at[0, :mo].set(marker_w.reshape(mo))
    sel = (jnp.arange(mo)[:, None] % o == jnp.arange(o)[None, :]).astype(jnp.float32)
    summat = jnp.zeros((dfin, op), jnp.float32).at[:mo, :o].set(sel)
    refc_p = jnp.zeros((op, cp), jnp.float32).at[:o, :c].set(ref_center)

    tn = _pick_tile(np_, tn_target, 32)
    nt = np_ // tn

    fea_s, f_raw, ssum, ssq = pl.pallas_call(
        _head_stats_kernel,
        out_shape=(jax.ShapeDtypeStruct((np_, dfin), jnp.float32),
                   jax.ShapeDtypeStruct((np_, op), jnp.float32),
                   jax.ShapeDtypeStruct((8, op), jnp.float32),
                   jax.ShapeDtypeStruct((8, op), jnp.float32)),
        grid=(nt,),
        in_specs=[pl.BlockSpec((tn, dfin), lambda r: (r, 0)),
                  pl.BlockSpec((1, dfin), lambda r: (0, 0)),
                  pl.BlockSpec((dfin, op), lambda r: (0, 0))],
        out_specs=(pl.BlockSpec((tn, dfin), lambda r: (r, 0)),
                   pl.BlockSpec((tn, op), lambda r: (r, 0)),
                   pl.BlockSpec((8, op), lambda r: (0, 0)),
                   pl.BlockSpec((8, op), lambda r: (0, 0))),
        compiler_params=pltpu.CompilerParams(dimension_semantics=("arbitrary",)),
    )(fea_pad, wflat, summat)

    # BatchNorm1d training-mode batch statistics (biased var), default affine init (gamma=1, beta=0).
    # Padded rows are all-zero and contribute nothing to the sums; divide by the real node count.
    # TODO(synk): running-mean/var buffer updates (training-side state) are not modeled.
    mu = ssum[0] / float(n_real)
    var = jnp.maximum(ssq[0] / float(n_real) - mu * mu, 0.0)
    bn_scale = jax.lax.rsqrt(var + bn_eps).reshape(1, op)
    bn_shift = (-mu * jax.lax.rsqrt(var + bn_eps)).reshape(1, op)

    f_act_pad, p_pad = pl.pallas_call(
        _make_head_finalize_kernel(1.0 / float(t2), slope, o),
        out_shape=(jax.ShapeDtypeStruct((np_, op), jnp.float32),
                   jax.ShapeDtypeStruct((np_, cp), jnp.float32)),
        grid=(nt,),
        in_specs=[pl.BlockSpec((tn, op), lambda r: (r, 0)),
                  pl.BlockSpec((1, op), lambda r: (0, 0)),
                  pl.BlockSpec((1, op), lambda r: (0, 0)),
                  pl.BlockSpec((op, cp), lambda r: (0, 0))],
        out_specs=(pl.BlockSpec((tn, op), lambda r: (r, 0)),
                   pl.BlockSpec((tn, cp), lambda r: (r, 0))),
        compiler_params=pltpu.CompilerParams(dimension_semantics=("parallel",)),
    )(f_raw, bn_scale, bn_shift, refc_p)

    return fea_s, f_act_pad, p_pad


# ----------------------------------------------------------------------------
# Full GraphClassifier forward
# ----------------------------------------------------------------------------
def graph_classifier_forward(adj_i8, x, marker_w, ref_center, *,
                             beta=1.0, temp=1.0, t1=5.0, t2=0.1, bf16_exp=False):
    n, d = x.shape
    m, o = marker_w.shape
    c = ref_center.shape[1]
    assert d == m * o
    scale = float(beta) / float(temp)

    # Pad node count to a multiple of 32 once; padded rows have no edges so they aggregate to zero
    # and never influence real rows.  All outputs are sliced back at the very end.
    np_ = -(-n // 32) * 32
    if np_ != n:
        x = jnp.pad(x, ((0, np_ - n), (0, 0)))
        adj_i8 = jnp.pad(adj_i8, ((0, np_ - n), (0, np_ - n)))

    tq, tk = _agnn_tiles(np_)
    ne = _block_nonempty(adj_i8, tq, tk)          # shared by all four AGNN calls
    kw = dict(bf16_exp=bf16_exp, block_nonempty=ne)

    # AGNN x2 on node features, lane/row-padded arrays passed straight through the chain.
    fea = agnn_conv(x, adj_i8, scale, valid_d=d, output_padded=True, **kw)
    fea = agnn_conv(fea, adj_i8, scale, valid_d=d, input_padded=True, output_padded=True, **kw)

    # MarkerWeight -> per-marker sum -> BatchNorm1d -> LeakyReLU -> softmax(f/t2) @ ref centroids
    fea_s_pad, f_act_pad, p_pad = classifier_head(fea, marker_w, ref_center, n_real=n, t2=t2)

    # AGNN x2 on the activated features; trailing softmax(out / t1) fused into the last finalize.
    out = agnn_conv(f_act_pad, adj_i8, scale, valid_d=o, input_padded=True,
                    output_padded=True, **kw)
    out = agnn_conv(out, adj_i8, scale, valid_d=o, input_padded=True, output_padded=True,
                    fuse_softmax_temp=t1, **kw)

    return (fea_s_pad[:n, :d], f_act_pad[:n, :o], p_pad[:n, :c], out[:n, :o])


# ----------------------------------------------------------------------------
# Pure-JAX reference mirroring the kernel's precision policy
# (f32 dst normalization, bf16-streamed src features, bf16 MXU inputs, f32 accumulation)
# ----------------------------------------------------------------------------
def _agnn_reference(feat, adj_bool, scale, bf16_exp=False):
    fk = feat.astype(jnp.bfloat16)
    fk32 = fk.astype(jnp.float32)
    nq = feat * jax.lax.rsqrt(jnp.maximum(jnp.sum(feat * feat, -1, keepdims=True), 1e-24))
    nk = fk32 * jax.lax.rsqrt(jnp.maximum(jnp.sum(fk32 * fk32, -1, keepdims=True), 1e-24))
    s = jnp.dot((nq * scale).astype(jnp.bfloat16), nk.astype(jnp.bfloat16).T,
                preferred_element_type=jnp.float32)
    masked = jnp.where(adj_bool, s, _NEG)
    mx = jnp.max(masked, axis=-1, keepdims=True)
    if bf16_exp:
        p = jnp.exp((masked - mx).astype(jnp.bfloat16)).astype(jnp.float32)
    else:
        p = jnp.exp(masked - mx)
    l = jnp.sum(p, axis=-1, keepdims=True)
    agg = jnp.dot(p.astype(jnp.bfloat16), fk, preferred_element_type=jnp.float32)
    has_edge = jnp.any(adj_bool, axis=-1, keepdims=True)
    return jnp.where(has_edge, agg / l, 0.0)


def _graph_classifier_reference(adj_bool, x, marker_w, ref_center, *,
                                beta, temp, t1, t2, bn_eps=1e-5, slope=0.25, bf16_exp=False):
    scale = beta / temp
    n = x.shape[0]
    m, o = marker_w.shape
    fea = _agnn_reference(_agnn_reference(x, adj_bool, scale, bf16_exp), adj_bool, scale, bf16_exp)
    fea3 = fea.reshape(n, m, o) * marker_w[None]
    f = fea3.sum(axis=1)
    fea_flat = fea3.reshape(n, m * o)
    mu = f.mean(axis=0, keepdims=True)
    var = jnp.mean((f - mu) ** 2, axis=0, keepdims=True)
    f = (f - mu) * jax.lax.rsqrt(var + bn_eps)
    f = jnp.where(f >= 0, f, slope * f)
    p = jax.nn.softmax(f / t2, axis=1) @ ref_center
    out = _agnn_reference(_agnn_reference(f, adj_bool, scale, bf16_exp), adj_bool, scale, bf16_exp)
    out = jax.nn.softmax(out / t1, axis=1)
    return fea_flat, f, p, out


if __name__ == "__main__":
    key = jax.random.PRNGKey(0)
    N, marker_dim, output_dim, n_classes = 64, 20, 16, 8
    D = marker_dim * output_dim                       # 320
    init_beta, temp, t1, t2 = 1.0, 1.0, 5.0, 0.1

    kx, ka, kw, kc = jax.random.split(key, 4)
    x = jax.random.normal(kx, (N, D), dtype=jnp.float32)
    adj_bool = jax.random.uniform(ka, (N, N)) < 0.25
    adj_bool = adj_bool.at[3, :].set(False)           # one zero-in-degree node (allowed)
    adj_i8 = adj_bool.astype(jnp.int8)
    marker_w = 1.0 + 0.1 * jax.random.normal(kw, (marker_dim, output_dim), dtype=jnp.float32)
    ref_center = jax.random.normal(kc, (output_dim, n_classes), dtype=jnp.float32)

    # single AGNN layer sanity check
    scale = init_beta / temp
    y = jax.block_until_ready(agnn_conv(x, adj_i8, scale))
    y_ref = _agnn_reference(x, adj_bool, scale)
    assert y.shape == (N, D)
    assert bool(jnp.allclose(y, y_ref, atol=5e-3, rtol=5e-3)), "AGNN layer mismatch"

    # full GraphClassifier forward (bf16_exp left off so v5e is safe and verification stays tight;
    # set bf16_exp=True on v6e/v7x in production)
    fea, f, p, out = graph_classifier_forward(adj_i8, x, marker_w, ref_center,
                                              beta=init_beta, temp=temp, t1=t1, t2=t2)
    fea, f, p, out = jax.block_until_ready((fea, f, p, out))
    fea_r, f_r, p_r, out_r = _graph_classifier_reference(
        adj_bool, x, marker_w, ref_center, beta=init_beta, temp=temp, t1=t1, t2=t2)

    assert fea.shape == (N, D) and f.shape == (N, output_dim)
    assert p.shape == (N, n_classes) and out.shape == (N, output_dim)
    assert bool(jnp.all(jnp.isfinite(fea)) & jnp.all(jnp.isfinite(f))
                & jnp.all(jnp.isfinite(p)) & jnp.all(jnp.isfinite(out)))
    assert bool(jnp.allclose(fea, fea_r, atol=2e-2, rtol=2e-2)), "fea mismatch"
    assert bool(jnp.allclose(f, f_r, atol=3e-2, rtol=3e-2)), "f mismatch"
    assert bool(jnp.allclose(out, out_r, atol=2e-2, rtol=2e-2)), "out mismatch"
    # t2=0.1 sharp softmax amplifies tiny per-row scale differences (bf16 / approx-recip);
    # compare with a looser tolerance.
    assert bool(jnp.allclose(p, p_r, atol=1e-1, rtol=1e-1)), "p mismatch"

    print("KERNEL_OK")
</pallas_src>

<mosaic_0001>
module attributes {stable_mosaic.version = 11 : i64} {
  func.func @kernel(%arg0: i32, %arg1: i32, %arg2: memref<2xi32, #tpu.memory_space<smem>>, %arg3: memref<32x384xf32, #tpu.memory_space<vmem>>, %arg4: memref<64x384xbf16, #tpu.memory_space<vmem>>, %arg5: memref<32x64xi8, #tpu.memory_space<vmem>>, %arg6: memref<32x384xf32, #tpu.memory_space<vmem>>, %arg7: memref<32x384xbf16, #tpu.memory_space<vmem>>, %arg8: memref<32x1xf32, #tpu.memory_space<vmem>>, %arg9: memref<32x1xf32, #tpu.memory_space<vmem>>, %arg10: memref<32x384xf32, #tpu.memory_space<vmem>>) attributes {dimension_semantics = [#tpu.dimension_semantics<parallel>, #tpu.dimension_semantics<arbitrary>], iteration_bounds = array<i64: 2, 1>, scalar_prefetch = 1 : i64, scratch_operands = 4 : i64, tpu.core_type = #tpu.core_type<tc>, window_params = [{transform_indices = @transform_0, window_bounds = array<i64: 32, 384>}, {transform_indices = @transform_1, window_bounds = array<i64: 64, 384>}, {transform_indices = @transform_2, window_bounds = array<i64: 32, 64>}, {transform_indices = @transform_3, window_bounds = array<i64: 32, 384>}]} {
    %c0_i32 = arith.constant 0 : i32
    %0 = arith.cmpi eq, %arg1, %c0_i32 : i32
    %1 = arith.extui %0 : i1 to i32
    %c0_i32_0 = arith.constant 0 : i32
    %2 = arith.cmpi ne, %1, %c0_i32_0 : i32
    scf.if %2 {
      %c0 = arith.constant 0 : index
      %c0_5 = arith.constant 0 : index
      %13 = vector.load %arg3[%c0, %c0_5] : memref<32x384xf32, #tpu.memory_space<vmem>>, vector<32x384xf32>
      %14 = arith.mulf %13, %13 : vector<32x384xf32>
      %cst = arith.constant dense<0.000000e+00> : vector<32xf32>
      %15 = vector.multi_reduction <add>, %14, %cst [1] : vector<32x384xf32> to vector<32xf32>
      %16 = vector.shape_cast %15 : vector<32xf32> to vector<32x1xf32>
      %cst_6 = arith.constant 1.000000e-24 : f32
      %17 = vector.broadcast %cst_6 : f32 to vector<32x1xf32>
      %18 = arith.maximumf %16, %17 : vector<32x1xf32>
      %19 = math.rsqrt %18 : vector<32x1xf32>
      %20 = vector.broadcast %19 : vector<32x1xf32> to vector<32x384xf32>
      %21 = arith.mulf %13, %20 : vector<32x384xf32>
      %cst_7 = arith.constant 1.000000e+00 : f32
      %22 = vector.broadcast %cst_7 : f32 to vector<32x384xf32>
      %23 = arith.mulf %21, %22 : vector<32x384xf32>
      %24 = arith.truncf %23 : vector<32x384xf32> to vector<32x384xbf16>
      %c0_8 = arith.constant 0 : index
      %c0_9 = arith.constant 0 : index
      %25 = vector.load %arg7[%c0_8, %c0_9] : memref<32x384xbf16, #tpu.memory_space<vmem>>, vector<32x384xbf16>
      tpu.vector_store %arg7[%c0_8, %c0_9], %24 {strides = array<i32>} : memref<32x384xbf16, #tpu.memory_space<vmem>>, vector<32x384xbf16>,
      %cst_10 = arith.constant -1.000000e+30 : f32
      %26 = vector.broadcast %cst_10 : f32 to vector<32x1xf32>
      %c0_11 = arith.constant 0 : index
      %c0_12 = arith.constant 0 : index
      %27 = vector.load %arg8[%c0_11, %c0_12] : memref<32x1xf32, #tpu.memory_space<vmem>>, vector<32x1xf32>
      tpu.vector_store %arg8[%c0_11, %c0_12], %26 {strides = array<i32>} : memref<32x1xf32, #tpu.memory_space<vmem>>, vector<32x1xf32>,
      %cst_13 = arith.constant 0.000000e+00 : f32
      %28 = vector.broadcast %cst_13 : f32 to vector<32x1xf32>
      %c0_14 = arith.constant 0 : index
      %c0_15 = arith.constant 0 : index
      %29 = vector.load %arg9[%c0_14, %c0_15] : memref<32x1xf32, #tpu.memory_space<vmem>>, vector<32x1xf32>
      tpu.vector_store %arg9[%c0_14, %c0_15], %28 {strides = array<i32>} : memref<32x1xf32, #tpu.memory_space<vmem>>, vector<32x1xf32>,
      %cst_16 = arith.constant 0.000000e+00 : f32
      %30 = vector.broadcast %cst_16 : f32 to vector<32x384xf32>
      %c0_17 = arith.constant 0 : index
      %c0_18 = arith.constant 0 : index
      %31 = vector.load %arg10[%c0_17, %c0_18] : memref<32x384xf32, #tpu.memory_space<vmem>>, vector<32x384xf32>
      tpu.vector_store %arg10[%c0_17, %c0_18], %30 {strides = array<i32>} : memref<32x384xf32, #tpu.memory_space<vmem>>, vector<32x384xf32>,
    } else {
    }
    %c1_i32 = arith.constant 1 : i32
    %3 = arith.muli %arg0, %c1_i32 : i32
    %4 = arith.addi %3, %arg1 : i32
    %5 = arith.index_cast %4 : i32 to index
    %6 = memref.load %arg2[%5] : memref<2xi32, #tpu.memory_space<smem>>
    %c0_i32_1 = arith.constant 0 : i32
    %7 = arith.cmpi ne, %6, %c0_i32_1 : i32
    %8 = arith.extui %7 : i1 to i32
    %c0_i32_2 = arith.constant 0 : i32
    %9 = arith.cmpi ne, %8, %c0_i32_2 : i32
    scf.if %9 {
      %c0 = arith.constant 0 : index
      %c0_5 = arith.constant 0 : index
      %13 = vector.load %arg4[%c0, %c0_5] : memref<64x384xbf16, #tpu.memory_space<vmem>>, vector<64x384xbf16>
      %14 = arith.extf %13 : vector<64x384xbf16> to vector<64x384xf32>
      %15 = arith.mulf %14, %14 : vector<64x384xf32>
      %cst = arith.constant dense<0.000000e+00> : vector<64xf32>
      %16 = vector.multi_reduction <add>, %15, %cst [1] : vector<64x384xf32> to vector<64xf32>
      %17 = vector.shape_cast %16 : vector<64xf32> to vector<64x1xf32>
      %cst_6 = arith.constant 1.000000e-24 : f32
      %18 = vector.broadcast %cst_6 : f32 to vector<64x1xf32>
      %19 = arith.maximumf %17, %18 : vector<64x1xf32>
      %20 = math.rsqrt %19 : vector<64x1xf32>
      %21 = vector.broadcast %20 : vector<64x1xf32> to vector<64x384xf32>
      %22 = arith.mulf %14, %21 : vector<64x384xf32>
      %c0_7 = arith.constant 0 : index
      %c0_8 = arith.constant 0 : index
      %23 = vector.load %arg7[%c0_7, %c0_8] : memref<32x384xbf16, #tpu.memory_space<vmem>>, vector<32x384xbf16>
      %24 = arith.truncf %22 : vector<64x384xf32> to vector<64x384xbf16>
      %cst_9 = arith.constant dense<0.000000e+00> : vector<32x64xf32>
      %25 = tpu.matmul %23, %24, %cst_9 {dimension_numbers = #tpu.dot_dimension_numbers<[1], [1], [0], [0], [0, 0, 1, 0], [], []>} : vector<32x384xbf16>, vector<64x384xbf16>, vector<32x64xf32> -> vector<32x64xf32>
      %c0_10 = arith.constant 0 : index
      %c0_11 = arith.constant 0 : index
      %26 = vector.load %arg5[%c0_10, %c0_11] : memref<32x64xi8, #tpu.memory_space<vmem>>, vector<32x64xi8>
      %c0_i8 = arith.constant 0 : i8
      %27 = vector.broadcast %c0_i8 : i8 to vector<32x64xi8>
      %28 = arith.cmpi ne, %26, %27 : vector<32x64xi8>
      %cst_12 = arith.constant -1.000000e+30 : f32
      %29 = vector.broadcast %cst_12 : f32 to vector<32x64xf32>
      %30 = arith.select %28, %25, %29 : vector<32x64xi1>, vector<32x64xf32>
      %c0_13 = arith.constant 0 : index
      %c0_14 = arith.constant 0 : index
      %31 = vector.load %arg8[%c0_13, %c0_14] : memref<32x1xf32, #tpu.memory_space<vmem>>, vector<32x1xf32>
      %cst_15 = arith.constant dense<0xFF800000> : vector<32xf32>
      %32 = vector.multi_reduction <maximumf>, %30, %cst_15 [1] : vector<32x64xf32> to vector<32xf32>
      %33 = vector.shape_cast %32 : vector<32xf32> to vector<32x1xf32>
      %34 = arith.maximumf %31, %33 : vector<32x1xf32>
      %35 = arith.subf %31, %34 : vector<32x1xf32>
      %36 = math.exp %35 : vector<32x1xf32>
      %37 = vector.broadcast %34 : vector<32x1xf32> to vector<32x64xf32>
      %38 = arith.subf %30, %37 : vector<32x64xf32>
      %39 = math.exp %38 : vector<32x64xf32>
      %40 = arith.truncf %39 : vector<32x64xf32> to vector<32x64xbf16>
      %cst_16 = arith.constant dense<0.000000e+00> : vector<32xf32>
      %41 = vector.multi_reduction <add>, %39, %cst_16 [1] : vector<32x64xf32> to vector<32xf32>
      %42 = vector.shape_cast %41 : vector<32xf32> to vector<32x1xf32>
      %c0_17 = arith.constant 0 : index
      %c0_18 = arith.constant 0 : index
      %43 = vector.load %arg9[%c0_17, %c0_18] : memref<32x1xf32, #tpu.memory_space<vmem>>, vector<32x1xf32>
      %44 = arith.mulf %36, %43 : vector<32x1xf32>
      %45 = arith.addf %44, %42 : vector<32x1xf32>
      %c0_19 = arith.constant 0 : index
      %c0_20 = arith.constant 0 : index
      %46 = vector.load %arg9[%c0_19, %c0_20] : memref<32x1xf32, #tpu.memory_space<vmem>>, vector<32x1xf32>
      tpu.vector_store %arg9[%c0_19, %c0_20], %45 {strides = array<i32>} : memref<32x1xf32, #tpu.memory_space<vmem>>, vector<32x1xf32>,
      %c0_21 = arith.constant 0 : index
      %c0_22 = arith.constant 0 : index
      %47 = vector.load %arg10[%c0_21, %c0_22] : memref<32x384xf32, #tpu.memory_space<vmem>>, vector<32x384xf32>
      %48 = vector.broadcast %36 : vector<32x1xf32> to vector<32x384xf32>
      %49 = arith.mulf %48, %47 : vector<32x384xf32>
      %cst_23 = arith.constant dense<0.000000e+00> : vector<32x384xf32>
      %50 = tpu.matmul %40, %13, %cst_23 {dimension_numbers = #tpu.dot_dimension_numbers<[1], [0], [0], [1], [0, 0, 1, 1], [], []>} : vector<32x64xbf16>, vector<64x384xbf16>, vector<32x384xf32> -> vector<32x384xf32>
      %51 = arith.addf %49, %50 : vector<32x384xf32>
      %c0_24 = arith.constant 0 : index
      %c0_25 = arith.constant 0 : index
      %52 = vector.load %arg10[%c0_24, %c0_25] : memref<32x384xf32, #tpu.memory_space<vmem>>, vector<32x384xf32>
      tpu.vector_store %arg10[%c0_24, %c0_25], %51 {strides = array<i32>} : memref<32x384xf32, #tpu.memory_space<vmem>>, vector<32x384xf32>,
      %c0_26 = arith.constant 0 : index
      %c0_27 = arith.constant 0 : index
      %53 = vector.load %arg8[%c0_26, %c0_27] : memref<32x1xf32, #tpu.memory_space<vmem>>, vector<32x1xf32>
      tpu.vector_store %arg8[%c0_26, %c0_27], %34 {strides = array<i32>} : memref<32x1xf32, #tpu.memory_space<vmem>>, vector<32x1xf32>,
    } else {
    }
    %c0_i32_3 = arith.constant 0 : i32
    %10 = arith.cmpi eq, %arg1, %c0_i32_3 : i32
    %11 = arith.extui %10 : i1 to i32
    %c0_i32_4 = arith.constant 0 : i32
    %12 = arith.cmpi ne, %11, %c0_i32_4 : i32
    scf.if %12 {
      %c0 = arith.constant 0 : index
      %c0_5 = arith.constant 0 : index
      %13 = vector.load %arg8[%c0, %c0_5] : memref<32x1xf32, #tpu.memory_space<vmem>>, vector<32x1xf32>
      %cst = arith.constant -5.000000e+29 : f32
      %14 = vector.broadcast %cst : f32 to vector<32x1xf32>
      %15 = arith.cmpf ogt, %13, %14 : vector<32x1xf32>
      %c0_6 = arith.constant 0 : index
      %c0_7 = arith.constant 0 : index
      %16 = vector.load %arg9[%c0_6, %c0_7] : memref<32x1xf32, #tpu.memory_space<vmem>>, vector<32x1xf32>
      %cst_8 = arith.constant 1.000000e-30 : f32
      %17 = vector.broadcast %cst_8 : f32 to vector<32x1xf32>
      %18 = arith.maximumf %16, %17 : vector<32x1xf32>
      %19 = tpu.reciprocal %18 {approx = true} : vector<32x1xf32> -> vector<32x1xf32>
      %c0_9 = arith.constant 0 : index
      %c0_10 = arith.constant 0 : index
      %20 = vector.load %arg10[%c0_9, %c0_10] : memref<32x384xf32, #tpu.memory_space<vmem>>, vector<32x384xf32>
      %21 = vector.broadcast %19 : vector<32x1xf32> to vector<32x384xf32>
      %22 = arith.mulf %20, %21 : vector<32x384xf32>
      %cst_11 = arith.constant 0.000000e+00 : f32
      %23 = vector.shape_cast %15 : vector<32x1xi1> to vector<32x1xi1>
      %24 = vector.broadcast %23 : vector<32x1xi1> to vector<32x384xi1>
      %25 = vector.broadcast %cst_11 : f32 to vector<32x384xf32>
      %26 = arith.select %24, %22, %25 : vector<32x384xi1>, vector<32x384xf32>
      %c0_12 = arith.constant 0 : index
      %c0_13 = arith.constant 0 : index
      %27 = vector.load %arg6[%c0_12, %c0_13] : memref<32x384xf32, #tpu.memory_space<vmem>>, vector<32x384xf32>
      tpu.vector_store %arg6[%c0_12, %c0_13], %26 {strides = array<i32>} : memref<32x384xf32, #tpu.memory_space<vmem>>, vector<32x384xf32>,
    } else {
    }
    return
  }
  func.func @transform_0(%arg0: i32, %arg1: i32, %arg2: memref<2xi32, #tpu.memory_space<smem>>) -> (i32, i32) {
    %c0_i32 = arith.constant 0 : i32
    %c0_i32_0 = arith.constant 0 : i32
    return %arg0, %c0_i32 : i32, i32
  }
  func.func @transform_1(%arg0: i32, %arg1: i32, %arg2: memref<2xi32, #tpu.memory_space<smem>>) -> (i32, i32) {
    %c0_i32 = arith.constant 0 : i32
    %c0_i32_0 = arith.constant 0 : i32
    return %arg1, %c0_i32 : i32, i32
  }
  func.func @transform_2(%arg0: i32, %arg1: i32, %arg2: memref<2xi32, #tpu.memory_space<smem>>) -> (i32, i32) {
    %c0_i32 = arith.constant 0 : i32
    return %arg0, %arg1 : i32, i32
  }
  func.func @transform_3(%arg0: i32, %arg1: i32, %arg2: memref<2xi32, #tpu.memory_space<smem>>) -> (i32, i32) {
    %c0_i32 = arith.constant 0 : i32
    %c0_i32_0 = arith.constant 0 : i32
    return %arg0, %c0_i32 : i32, i32
  }
}

</mosaic_0001>

<bundles_post_ra>
// kernel: tpu_custom_call.1
= control target key start
LH: loop header
LB: loop body
LE: loop exit
PB: predicated region body
PF: predicated region fallthrough
CT: control target
= control target key end

     0   :  { %s2294_s0 = inlined_call_operand.hbm [shape: s32[2], index: 0, kind: input, shape index: {}]   ;;  %s2295_s1 = inlined_call_operand.hbm [shape: f32[64,384], index: 1, kind: input, shape index: {}]   ;;  %s2296_s2 = inlined_call_operand.hbm [shape: bf16[64,384], index: 2, kind: input, shape index: {}]   ;;  %s2297_s3 = inlined_call_operand.hbm [shape: s8[64,64], index: 3, kind: input, shape index: {}]   ;;  %s2298_s4 = inlined_call_operand.hbm [shape: f32[64,384], index: 4, kind: output, shape index: {}]  }
   0x1   :  { %2307 = sst [smem:[#allocation21_spill]] %s2295_s1  ;;  %s1460_s17 = scalar_lea.hbm %s2294_s0, 16 }
   0x2   :  { %p1461_p0 = scmp.ne.s32.totalorder %s2294_s0, %s1460_s17  ;;  %p1464_p1 = scmp.lt.u32.totalorder %s1460_s17, %s2294_s0 }
   0x4   :  { %p1466_p2 = pnand %p1464_p1, %p1461_p0 }
   0x6   :  { %1469 = shalt.err (!%p1466_p2)  }
   0x7   :  { %s1652_s22 = smov [#allocation7]  }
   0x8   :  { %10 = dma.hbm_to_smem %s2294_s0, 16, %s1652_s22, [#allocation6] }
   0x9   :  { %1610 = dma.done.wait [#allocation6], 16 }
   0xa   :  { %1611 = vsyncadd [#allocation6], 4294967280 }
   0xb   :  { %12 = sfence }
   0xc   :  { %13 = vsyncpa [#allocation9], 0 }
   0xd   :  { %15 = vsyncpa [#allocation9 + $0x1], 0 }
   0xe   :  { %16 = vsyncpa [#allocation12], 0 }
   0xf   :  { %17 = vsyncpa [#allocation10], 0 }
  0x10   :  { %19 = vsyncpa [#allocation10 + $0x1], 0  ;;  %s1704_s25 = smov 0   ;;  %s1706_s26 = smov 0  }
  0x11   :  { %s1708_s27 = smov 0   ;;  %s1710_s28 = smov 0  }
  0x12   :  { %s1712_s29 = smov 0   ;;  %s1714_s30 = smov 0  }
  0x13 LB: > { %s37_s0 = sadd.s32 1, %s1646_s29  ;;  %s44_s5 = sadd.s32 1, %s1638_s27  ;;  %s1650_s30 = sphi %s1714_s30, %s25_s30   ;;  %s1646_s29 = sphi %s1712_s29, %s2331_s29   ;;  %s1642_s28 = sphi %s1710_s28, %s2330_s28   ;;  %s1638_s27 = sphi %s1708_s27, %s2329_s27   ;;  %s1634_s26 = sphi %s1706_s26, %s2328_s26   ;;  %s1630_s25 = sphi %s1704_s25, %s2327_s25  }
  0x14   : > { %p39_p3 = scmp.ge.s32.totalorder %s37_s0, 2  ;;  %p51_p4 = scmp.ne.s32.totalorder %s1638_s27, %s1634_s26 }
  0x15   : > { %p52_p5 = scmp.eq.s32.totalorder %s1650_s30, 0  ;;  %p1345_p8 = scmp.lt.s32.totalorder %s1650_s30, 2 }
  0x16   : > { %s2333_s0 = smov (%p39_p3, %s37_s0), 0  ;;  %s178_s7 = sand.u32 1, %s1650_s30  }
  0x17   : > { %2308 = sst [smem:[#allocation20_spill]] %s2333_s0  ;;  %p53_p7 = por %p52_p5, %p51_p4 }
  0x18   : > { %s41_s6 = ssub.s32 %s1646_s29, %s2333_s0  ;;  %s180_s8 = sand.u32 1, %s1638_s27  }
  0x19   : > { %p42_p9 = scmp.eq.s32.totalorder %s41_s6, 0  ;;  %s1316_s9 = smul.u32 1536, %s1646_s29 }
  0x1a   : > { %s1315_s11 = smul.u32 96, %s180_s8  ;;  %s2309_s1 = sld [smem:[#allocation21_spill]] }
  0x1b   : > { %s1752_s10 = scalar_select %p42_p9, %s1638_s27, %s44_s5  }
  0x1c   : > { %p1761_p10 = pnand %p1345_p8, %p53_p7  ;;  %s182_s16 = scalar_lea.vmem [#allocation8], %s1315_s11 }
  0x1d   : > { %s190_s17 = sshll.u32 %s182_s16, 4  ;;  %s1767_s18 = scalar_lea.sflag [#allocation9], %s178_s7  ;;  %s1765_s17 = int_to_ptr.vmem [resolvable:$true] %s190_s17 }
  0x1e   : > { %s2310_s15 = scalar_select %p1761_p10, 1, 0 }
  0x1f   : > { %p2301_p12 = pneg %p1761_p10 }
  0x20   : > { %s1759_s14 = scalar_lea.hbm %s2309_s1, %s1316_s9  ;;  %s1475_s22 = scalar_lea.hbm %s2309_s1, 3072 }
  0x21   : > { %s1470_s19 = scalar_lea.hbm %s1759_s14, 1536  ;;  %p1476_p1 = scmp.lt.u32.totalorder %s1759_s14, %s2309_s1 }
  0x22   : > { %p1471_p11 = scmp.ne.s32.totalorder %s1759_s14, %s1470_s19  ;;  %p1477_p2 = scmp.lt.u32.totalorder %s1475_s22, %s1470_s19 }
  0x23   : > { %p1479_p5 = scmp.lt.u32.totalorder %s1470_s19, %s1759_s14 }
  0x24   : > { %p1473_p13 = pnand %p2301_p12, %p1471_p11  ;;  %p1478_p3 = por %p1477_p2, %p1476_p1 }
  0x26   : > { %p1474_p0 = pneg %p1473_p13  ;;  %p1480_p7 = por %p1479_p5, %p1478_p3 }
  0x28   : > { %p1481_p8 = pnand %p1480_p7, %p1474_p0 }
  0x2a   : > { %1484 = shalt.err (!%p1481_p8)
}
  0x2b   : > { %s1485_s5 = scalar_lea.vmem %s1765_s17, 1536  ;;  %s1653_s6 = smov [#allocation8]  }
  0x2c   : > { %p1486_p9 = scmp.ne.s32.totalorder %s1765_s17, %s1485_s5  ;;  %s1490_s7 = sshll.u32 %s1653_s6, 4  ;;  %s1491_s7 = int_to_ptr.vmem [resolvable:$false] %s1490_s7 }
  0x2d   : > { %s1492_s9 = scalar_lea.vmem %s1491_s7, 3072  ;;  %p1493_p6 = scmp.lt.s32.totalorder %s1765_s17, %s1491_s7 }
  0x2e   : > { %p1488_p11 = pnand %p1486_p9, %p2301_p12  ;;  %p1494_p1 = scmp.lt.s32.totalorder %s1492_s9, %s1485_s5 }
  0x30   : > { %p1489_p13 = pneg %p1488_p11  ;;  %p1495_p2 = por %p1494_p1, %p1493_p6 }
  0x32   : > { %p1496_p3 = pnand %p1495_p2, %p1489_p13 }
  0x34   : > { %1499 = shalt.err (!%p1496_p3)
}
  0x35   : > { %s1654_s11 = smov 384   ;;  %s1655_s12 = smov 24  }
  0x36   : > { %1336 = dma.hbm_to_vmem [thread:$0]  (!%p1761_p10), %s1759_s14, 1536, %s1765_s17, %s1767_s18, %s1654_s11, %s1654_s11, %s1655_s12  }
  0x37   : > { %s1796_s13 = sadd.s32 4294967295, %s1650_s30   ;;  %s1245_s16 = sadd.s32 4294967294, %s1650_s30  }
  0x38   : > { %p57_p6 = scmp.ne.s32.totalorder %s1634_s26, %s1630_s25  ;;  %p2300_p0 = scmp.eq.s32.totalorder %s1796_s13, 0 }
  0x39   : > { %p135_p5 = scmp.eq.s32.totalorder %s1796_s13, 1  ;;  %p141_p7 = scmp.eq.s32.totalorder %s1245_s16, 1 }
  0x3a   : > { %p1246_p8 = scmp.ge.s32.totalorder %s1650_s30, 1  ;;  %p1806_p9 = por %p2300_p0, %p57_p6 }
  0x3b   : > { %p1813_p11 = por %p135_p5, %p51_p4  ;;  %p1817_p13 = por %p141_p7, %p57_p6 }
  0x3c   : > { %s2311_s19 = scalar_select %p1806_p9, 1, 0 }
  0x3d   : > { %s2312_s14 = scalar_select %p1813_p11, 1, 0 }
  0x3e   : > { %s2313_s17 = scalar_select %p1817_p13, 1, 0 }
  0x3f   : > { %p148_p1 = scmp.lt.s32.totalorder %s1650_s30, 3  ;;  %s1656_s21 = smov [#allocation11]  }
  0x40   : > { %s164_s22 = sshll.u32 %s1656_s21, 4  ;;  %s1252_s23 = sshll.u32 %s180_s8, 3  ;;  %s1826_s22 = int_to_ptr.vmem [resolvable:$true] %s164_s22 }
  0x41   : > { %p1822_p2 = pnand %p1246_p8, %p148_p1  ;;  %s1253_s24 = sshll.u32 %s1646_s29, 7 }
  0x42   : > { %s1842_s9 = scalar_lea.hbm %s2297_s3, %s1253_s24  ;;  %s204_s11 = scalar_lea.vmem [#allocation13], %s1252_s23 }
  0x43   : > { %s2314_s20 = scalar_select %p1822_p2, 1, 0 }
  0x44   : > { %p1329_p3 = pneg %p1822_p2  ;;  %s212_s12 = sshll.u32 %s204_s11, 4  ;;  %s1844_s12 = int_to_ptr.vmem [resolvable:$true] %s212_s12 }
  0x45   : > { %s1500_s8 = scalar_lea.hbm %s2296_s2, 1536 }
  0x46   : > { %p1835_p4 = pnand %p1329_p3, %p2300_p0  ;;  %p1501_p6 = scmp.ne.s32.totalorder %s2296_s2, %s1500_s8 }
  0x47   : > { %p1507_p1 = scmp.lt.u32.totalorder %s1500_s8, %s2296_s2 }
  0x48   : > { %p1502_p5 = pneg %p1835_p4 }
  0x4a   : > { %p1503_p7 = pnand %p1502_p5, %p1501_p6 }
  0x4c   : > { %p1504_p8 = pneg %p1503_p7 }
  0x4e   : > { %p1509_p3 = pnand %p1507_p1, %p1504_p8 }
  0x50   : > { %1512 = shalt.err (!%p1509_p3)
}
  0x51   : > { %s1513_s23 = scalar_lea.vmem %s1826_s22, 1536  ;;  %p1521_p11 = scmp.lt.s32.totalorder %s1826_s22, %s1826_s22 }
  0x52   : > { %p1514_p0 = scmp.ne.s32.totalorder %s1826_s22, %s1513_s23  ;;  %p1522_p9 = scmp.lt.s32.totalorder %s1513_s23, %s1513_s23 }
  0x54   : > { %p1516_p12 = pnand %p1514_p0, %p1502_p5  ;;  %p1523_p2 = por %p1522_p9, %p1521_p11 }
  0x56   : > { %p1517_p13 = pneg %p1516_p12 }
  0x58   : > { %p1524_p10 = pnand %p1523_p2, %p1517_p13 }
  0x5a   : > { %1527 = shalt.err (!%p1524_p10)
}
  0x5b   : > { %s1657_s1 = smov 192   ;;  %s1658_s0 = smov 12  }
  0x5c   : > { %1332 = dma.hbm_to_vmem [thread:$0]  (!%p1835_p4), %s2296_s2, 1536, %s1826_s22, [#allocation12], %s1657_s1, %s1657_s1, %s1658_s0  }
  0x5d   : > { %s1528_s16 = scalar_lea.hbm %s1842_s9, 128  ;;  %p2316_p0 = scmp.ne.s32.totalorder %s2310_s15, 0 }
  0x5e   : > { %p1529_p12 = scmp.ne.s32.totalorder %s1842_s9, %s1528_s16  ;;  %s1533_s6 = scalar_lea.hbm %s2297_s3, 256 }
  0x5f   : > { %p2317_p9 = pneg %p2316_p0  ;;  %p1534_p13 = scmp.lt.u32.totalorder %s1842_s9, %s2297_s3 }
  0x60   : > { %p1535_p2 = scmp.lt.u32.totalorder %s1533_s6, %s1528_s16  ;;  %p1537_p5 = scmp.lt.u32.totalorder %s1528_s16, %s1842_s9 }
  0x61   : > { %p1531_p11 = pnand %p1529_p12, %p2317_p9 }
  0x62   : > { %p1536_p6 = por %p1535_p2, %p1534_p13 }
  0x63   : > { %p1532_p10 = pneg %p1531_p11 }
  0x64   : > { %p1538_p7 = por %p1537_p5, %p1536_p6 }
  0x66   : > { %p1539_p8 = pnand %p1538_p7, %p1532_p10 }
  0x68   : > { %1542 = shalt.err (!%p1539_p8)
}
  0x69   : > { %s1543_s22 = scalar_lea.vmem %s1844_s12, 128  ;;  %p2318_p1 = pmov %p2317_p9 }
  0x6a   : > { %p1544_p4 = scmp.ne.s32.totalorder %s1844_s12, %s1543_s22  ;;  %s1659_s5 = smov [#allocation13]  }
  0x6b   : > { %s1548_s1 = sshll.u32 %s1659_s5, 4  ;;  %s1549_s1 = int_to_ptr.vmem [resolvable:$false] %s1548_s1 }
  0x6c   : > { %p1546_p3 = pnand %p1544_p4, %p2318_p1  ;;  %s1550_s0 = scalar_lea.vmem %s1549_s1, 256 }
  0x6d   : > { %p1551_p9 = scmp.lt.s32.totalorder %s1844_s12, %s1549_s1  ;;  %p1552_p11 = scmp.lt.s32.totalorder %s1550_s0, %s1543_s22 }
  0x6e   : > { %p1547_p12 = pneg %p1546_p3 }
  0x6f   : > { %p1553_p13 = por %p1552_p11, %p1551_p9 }
  0x71   : > { %p1554_p2 = pnand %p1553_p13, %p1547_p12 }
  0x73   : > { %1557 = shalt.err (!%p1554_p2)
}
  0x74   : > { %1339 = dma.hbm_to_vmem [thread:$0]  (!%p2316_p0), %s1842_s9, 128, %s1844_s12, %s1767_s18  }
  0x75   : > { %p2319_p10 = scmp.ne.s32.totalorder %s2314_s20, 0 }
  0x76   : > { %s223_s24 = sand.u32 (!%p2319_p10), 1, %s1796_s13   ;;  %s1895_s11 = sand.u32 (!%p2319_p10), 1, %s1634_s26  }
  0x77   : > { %221 = sbr.rel (%p2319_p10) target bundleno = 1409 (0x581), region = 32  ;;  %s224_s21 = scalar_lea.sflag (!%p2319_p10), [#allocation9], %s223_s24 }
  0x78   : > { %s1317_s16 = smul.u32 (!%p2319_p10), 96, %s1895_s11  ;;  %p2320_p6 = scmp.ne.s32.totalorder (!%p2319_p10), %s2311_s19, 0 }
  0x7a   : > { %s1900_s8 = scalar_lea.vmem (!%p2319_p10), [#allocation8], %s1317_s16 }
  0x7e   : > { %1613 = dma.done.wait (%p2320_p6), %s224_s21, 1536  }
  0x7f   : > { %1615 = vsyncadd (%p2320_p6), %s224_s21, 4294965760  ;;  %p2321_p0 = scmp.eq.s32.totalorder %s1796_s13, 0 }
  0x81   : > { %1617 = dma.done.wait (%p2321_p0), [#allocation12], 1536   ;;  %p2322_p5 = pmov %p2321_p0 }
  0x82   : > { %s1256_s15 = sshll.u32 %s1895_s11, 3 }
  0x83   : > { %1619 = vsyncadd (%p2322_p5), [#allocation12], 4294965760  ;;  %s1911_s18 = scalar_lea.vmem [#allocation13], %s1256_s15 }
  0x84   : > { %1621 = dma.done.wait (%p2320_p6), %s224_s21, 128  }
  0x85   : > { %1623 = vsyncadd (%p2320_p6), %s224_s21, 4294967168  ;;  %vm350_vm0 = vcmask 7168   ;;  %v1660_v0 = vmov -1e+30   ;;  %v1661_v1 = vmov 0.0   ;;  %s1926_s13 = sld [smem:[#allocation7 + %s1642_s28]] }
  0x86   : > { %351 = vst.msk [vmem:[#allocation3] sm:$0xff] %vm350_vm0, %v1660_v0  ;;  %352 = vst.msk [vmem:[#allocation3 + $0x8] sm:$0xff] %vm350_vm0, %v1660_v0  ;;  %v284_v2 = vld [vmem:[%s1900_s8 + $0x30] sm:$0xff]  ;;  %v285_v3 = vld [vmem:[%s1900_s8 + $0x38] sm:$0xff]  ;;  %s1942_s19 = scalar_lea.vmem [#allocation14], %s1317_s16 }
  0x87   : > { %353 = vst.msk [vmem:[#allocation3 + $0x10] sm:$0xff] %vm350_vm0, %v1660_v0  ;;  %354 = vst.msk [vmem:[#allocation3 + $0x18] sm:$0xff] %vm350_vm0, %v1660_v0  ;;  %v286_v4 = vld [vmem:[%s1900_s8 + $0x40] sm:$0xff]  ;;  %v296_v5 = vmul.f32 %v284_v2, %v284_v2  ;;  %v297_v6 = vmul.f32 %v285_v3, %v285_v3  ;;  %v279_v9 = vld [vmem:[%s1900_s8 + $0x8] sm:$0xff] }
  0x88   : > { %355 = vst.msk [vmem:[#allocation4] sm:$0xff] %vm350_vm0, %v1661_v1  ;;  %356 = vst.msk [vmem:[#allocation4 + $0x8] sm:$0xff] %vm350_vm0, %v1661_v1  ;;  %v298_v7 = vmul.f32 %v286_v4, %v286_v4  ;;  %v278_v8 = vld [vmem:[%s1900_s8] sm:$0xff]  ;;  %v280_v10 = vld [vmem:[%s1900_s8 + $0x10] sm:$0xff]  ;;  %v291_v12 = vmul.f32 %v279_v9, %v279_v9 }
  0x89   : > { %357 = vst.msk [vmem:[#allocation4 + $0x10] sm:$0xff] %vm350_vm0, %v1661_v1  ;;  %358 = vst.msk [vmem:[#allocation4 + $0x18] sm:$0xff] %vm350_vm0, %v1661_v1  ;;  %v290_v11 = vmul.f32 %v278_v8, %v278_v8  ;;  %v292_v13 = vmul.f32 %v280_v10, %v280_v10  ;;  %v287_v14 = vld [vmem:[%s1900_s8 + $0x48] sm:$0xff]  ;;  %v288_v15 = vld [vmem:[%s1900_s8 + $0x50] sm:$0xff]  ;;  %v310_v17 = vadd.f32 %v297_v6, %v296_v5 }
  0x8a   : > { %359 = vst [vmem:[#allocation5] sm:$0xff] %v1661_v1  ;;  %360 = vst [vmem:[#allocation5 + $0x8] sm:$0xff] %v1661_v1  ;;  %v289_v16 = vld [vmem:[%s1900_s8 + $0x58] sm:$0xff]  ;;  %v299_v18 = vmul.f32 %v287_v14, %v287_v14  ;;  %v300_v19 = vmul.f32 %v288_v15, %v288_v15  ;;  %v282_v22 = vld [vmem:[%s1900_s8 + $0x20] sm:$0xff] }
  0x8b   : > { %361 = vst [vmem:[#allocation5 + $0x10] sm:$0xff] %v1661_v1  ;;  %362 = vst [vmem:[#allocation5 + $0x18] sm:$0xff] %v1661_v1  ;;  %v301_v20 = vmul.f32 %v289_v16, %v289_v16  ;;  %v281_v21 = vld [vmem:[%s1900_s8 + $0x18] sm:$0xff]  ;;  %v283_v23 = vld [vmem:[%s1900_s8 + $0x28] sm:$0xff]  ;;  %v302_v24 = vadd.f32 %v291_v12, %v290_v11  ;;  %v294_v26 = vmul.f32 %v282_v22, %v282_v22  ;;  %p1257_p7 = scmp.eq.s32.totalorder %s1926_s13, 0 }
  0x8c   : > { %363 = vst [vmem:[#allocation5 + $0x20] sm:$0xff] %v1661_v1  ;;  %364 = vst [vmem:[#allocation5 + $0x28] sm:$0xff] %v1661_v1  ;;  %v293_v25 = vmul.f32 %v281_v21, %v281_v21  ;;  %v295_v27 = vmul.f32 %v283_v23, %v283_v23  ;;  %v311_v28 = vadd.f32 %v310_v17, %v298_v7  ;;  %v1945_v0 = vld [vmem:[#allocation11] sm:$0xff] (!%p1257_p7)  ;;  %vm668_vm7 = vcmask (!%p1257_p7), 523264  }
  0x8d   : > { %365 = vst [vmem:[#allocation5 + $0x30] sm:$0xff] %v1661_v1  ;;  %366 = vst [vmem:[#allocation5 + $0x38] sm:$0xff] %v1661_v1  ;;  %v314_v29 = vadd.f32 %v300_v19, %v299_v18  ;;  %v303_v30 = vadd.f32 %v302_v24, %v292_v13  ;;  %v1960_v6 = vld [vmem:[#allocation11 + $0x20] sm:$0xf] (!%p1257_p7)  ;;  %v1991_v19 = vld [vmem:[#allocation11 + $0x2c] sm:$0xf] (!%p1257_p7) }
  0x8e   : > { %367 = vst [vmem:[#allocation5 + $0x40] sm:$0xff] %v1661_v1  ;;  %368 = vst [vmem:[#allocation5 + $0x48] sm:$0xff] %v1661_v1  ;;  %v306_v31 = vadd.f32 %v294_v26, %v293_v25  ;;  %312 = vadd.xlane.f32.xlu1 %v311_v28  ;;  %v1973_v11 = vunpack.c.l.bf16 (!%p1257_p7), %v1960_v6 }
  0x8f   : > { %369 = vst [vmem:[#allocation5 + $0x50] sm:$0xff] %v1661_v1  ;;  %370 = vst [vmem:[#allocation5 + $0x58] sm:$0xff] %v1661_v1  ;;  %v315_v32 = vadd.f32 %v314_v29, %v301_v20  ;;  %304 = vadd.xlane.f32.xlu0 %v303_v30  ;;  %v1947_v1 = vld [vmem:[#allocation11 + $0x8] sm:$0xf] (!%p1257_p7)  ;;  %v1993_v20 = vld [vmem:[#allocation11 + $0x3c] sm:$0xff] (!%p1257_p7) }
  0x90   : > { %v307_v33 = vadd.f32 %v306_v31, %v295_v27  ;;  %v1958_v5 = vunpack.c.l.bf16 (!%p1257_p7), %v1947_v1  ;;  %v2012_v29 = vld [vmem:[#allocation11 + $0x44] sm:$0xf] (!%p1257_p7) }
  0x92   : > { %316 = vadd.xlane.f32.xlu1 %v315_v32  ;;  %v419_v17 = vmul.f32 (!%p1257_p7), %v1958_v5, %v1958_v5  ;;  %v2017_v32 = vunpack.c.l.bf16 (!%p1257_p7), %v1991_v19 }
  0x93   : > { %308 = vadd.xlane.f32.xlu0 %v307_v33  ;;  %v2020_v33 = vunpack.c.l.bf16 (!%p1257_p7), %v1993_v20 }
 0x11b   : > { %v313_v34 = vpop.xlane.xlu1 %312 }
 0x11c   : > { %v320_v35 = vmax.f32 %v313_v34, 1e-24  ;;  %v305_v36 = vpop.xlane.xlu0 %304  ;;  %v2022_v34 = vld [vmem:[#allocation11 + $0x30] sm:$0xff] (!%p1257_p7) }
 0x11d   : > { %v318_v37 = vmax.f32 %v305_v36, 1e-24 }
 0x11e   : > { %1408 = vrsqrt.f32 %v320_v35 }
 0x11f   : > { %1410 = vrsqrt.f32 %v318_v37  ;;  %v317_v38 = vpop.xlane.xlu1 %316 }
 0x120   : > { %v321_v39 = vmax.f32 %v317_v38, 1e-24  ;;  %v309_v40 = vpop.xlane.xlu0 %308 }
 0x121   : > { %v319_v41 = vmax.f32 %v309_v40, 1e-24 }
 0x122   : > { %1412 = vrsqrt.f32 %v321_v39  ;;  %v2028_v39 = vld [vmem:[#allocation11 + $0x38] sm:$0xf] (!%p1257_p7) }
 0x123   : > { %1414 = vrsqrt.f32 %v319_v41  ;;  %v428_v41 = vmul.f32 (!%p1257_p7), %v2017_v32, %v2017_v32 }
 0x128   : > { %v1409_v42 = vpop.eup %1408 }
 0x129   : > { %v1411_v43 = vpop.eup %1410  ;;  %v332_v45 = vmul.f32 %v1409_v42, %v284_v2  ;;  %v333_v46 = vmul.f32 %v1409_v42, %v285_v3  ;;  %v334_v47 = vmul.f32 %v1409_v42, %v286_v4  ;;  %v1949_v2 = vld [vmem:[#allocation11 + $0x18] sm:$0xff] (!%p1257_p7)  ;;  %v1952_v3 = vunpack.c.l.bf16 (!%p1257_p7), %v1945_v0 }
 0x12a   : > { %v326_v48 = vmul.f32 %v1411_v43, %v278_v8  ;;  %v327_v50 = vmul.f32 %v1411_v43, %v279_v9  ;;  %v328_v54 = vmul.f32 %v1411_v43, %v280_v10  ;;  %v1955_v4 = vunpack.c.h.bf16 (!%p1257_p7), %v1945_v0  ;;  %v1965_v8 = vld [vmem:[#allocation11 + $0xc] sm:$0xff] (!%p1257_p7)  ;;  %v1967_v9 = vld [vmem:[#allocation11 + $0x14] sm:$0xf] (!%p1257_p7) }
 0x12b   : > { %v1963_v7 = vunpack.c.l.bf16 (!%p1257_p7), %v1949_v2  ;;  %v1970_v10 = vunpack.c.h.bf16 (!%p1257_p7), %v1949_v2  ;;  %v1976_v12 = vunpack.c.l.bf16 (!%p1257_p7), %v1965_v8  ;;  %v1979_v13 = vunpack.c.h.bf16 (!%p1257_p7), %v1965_v8 }
 0x12c   : > { %v1413_v44 = vpop.eup %1412  ;;  %v2033_v42 = vunpack.c.h.bf16 (!%p1257_p7), %v1993_v20  ;;  %v2036_v43 = vunpack.c.l.bf16 (!%p1257_p7), %v2012_v29 }
 0x12d   : > { %v1415_v49 = vpop.eup %1414  ;;  %v335_v51 = vmul.f32 %v1413_v44, %v287_v14  ;;  %v336_v52 = vmul.f32 %v1413_v44, %v288_v15  ;;  %v337_v53 = vmul.f32 %v1413_v44, %v289_v16  ;;  %376 = sbr.rel (%p1257_p7) target bundleno = 1239 (0x4d7), region = 52  ;;  %v1981_v14 = vld [vmem:[#allocation11 + $0x24] sm:$0xff] (!%p1257_p7)  ;;  %v417_v15 = vmul.f32 (!%p1257_p7), %v1952_v3, %v1952_v3  ;;  %v2038_v44 = vld [vmem:[#allocation11 + $0x54] sm:$0xff] (!%p1257_p7) }
 0x12e   : > { %v329_v55 = vmul.f32 %v1415_v49, %v281_v21  ;;  %v330_v56 = vmul.f32 %v1415_v49, %v282_v22  ;;  %v331_v57 = vmul.f32 %v1415_v49, %v283_v23  ;;  %v418_v16 = vmul.f32 (!%p1257_p7), %v1955_v4, %v1955_v4  ;;  %v2045_v49 = vld [vmem:[#allocation11 + $0x5c] sm:$0xf] (!%p1257_p7) }
 0x12f   : > { %v341_v58 = vpack.c.bf16 %v335_v51, %v332_v45  ;;  %v342_v59 = vpack.c.bf16 %v336_v52, %v333_v46  ;;  %v343_v60 = vpack.c.bf16 %v337_v53, %v334_v47  ;;  %v423_v18 = vmul.f32 (!%p1257_p7), %v1963_v7, %v1963_v7 }
 0x130   : > { %v338_v61 = vpack.c.bf16 %v329_v55, %v326_v48  ;;  %v339_v62 = vpack.c.bf16 %v330_v56, %v327_v50  ;;  %v340_v63 = vpack.c.bf16 %v331_v57, %v328_v54  ;;  %v424_v21 = vmul.f32 (!%p1257_p7), %v1970_v10, %v1970_v10  ;;  %v2057_v54 = vld [vmem:[#allocation11 + $0x48] sm:$0xff] (!%p1257_p7) }
 0x131   : > { %347 = vst [vmem:[#allocation2 + $0x18] sm:$0xff] %v341_v58  ;;  %348 = vst [vmem:[#allocation2 + $0x20] sm:$0xff] %v342_v59  ;;  %v425_v22 = vmul.f32 (!%p1257_p7), %v1973_v11, %v1973_v11  ;;  %v2000_v23 = vunpack.c.l.bf16 (!%p1257_p7), %v1967_v9  ;;  %v420_v24 = vmul.f32 (!%p1257_p7), %v1976_v12, %v1976_v12  ;;  %v441_v25 = vadd.f32 (!%p1257_p7), %v418_v16, %v417_v15  ;;  %v2067_v59 = vld [vmem:[#allocation11 + $0x50] sm:$0xf] (!%p1257_p7) }
 0x132   : > { %349 = vst [vmem:[#allocation2 + $0x28] sm:$0xff] %v343_v60  ;;  %344 = vst [vmem:[#allocation2] sm:$0xff] %v338_v61  ;;  %v421_v26 = vmul.f32 (!%p1257_p7), %v1979_v13, %v1979_v13  ;;  %v2007_v27 = vunpack.c.l.bf16 (!%p1257_p7), %v1981_v14  ;;  %v2010_v28 = vunpack.c.h.bf16 (!%p1257_p7), %v1981_v14  ;;  %v449_v30 = vadd.f32 (!%p1257_p7), %v424_v21, %v423_v18 }
 0x133   : > { %345 = vst [vmem:[#allocation2 + $0x8] sm:$0xff] %v339_v62  ;;  %346 = vst [vmem:[#allocation2 + $0x10] sm:$0xff] %v340_v63  ;;  %v422_v31 = vmul.f32 (!%p1257_p7), %v2000_v23, %v2000_v23  ;;  %v442_v35 = vadd.f32 (!%p1257_p7), %v441_v25, %v419_v17  ;;  %v432_v47 = vmul.f32 (!%p1257_p7), %v2020_v33, %v2020_v33  ;;  %v2043_v48 = vunpack.c.l.bf16 (!%p1257_p7), %v2022_v34 }
 0x134   : > { %v445_v36 = vadd.f32 %v421_v26, %v420_v24  ;;  %v426_v37 = vmul.f32 %v2007_v27, %v2007_v27  ;;  %v427_v38 = vmul.f32 %v2010_v28, %v2010_v28  ;;  %v450_v40 = vadd.f32 %v449_v30, %v425_v22 }
 0x135   : > { %443 = vadd.xlane.f32.xlu0 %v442_v35  ;;  %v433_v50 = vmul.f32 %v2033_v42, %v2033_v42  ;;  %v434_v51 = vmul.f32 %v2036_v43, %v2036_v43  ;;  %v2052_v52 = vunpack.c.h.bf16 %v2022_v34  ;;  %v2055_v53 = vunpack.c.l.bf16 %v2028_v39 }
 0x136   : > { %v446_v45 = vadd.f32 %v445_v36, %v422_v31  ;;  %v453_v46 = vadd.f32 %v427_v38, %v426_v37  ;;  %451 = vadd.xlane.f32.xlu1 %v450_v40  ;;  %v429_v56 = vmul.f32 %v2043_v48, %v2043_v48  ;;  %v2062_v57 = vunpack.c.l.bf16 %v2038_v44 }
 0x137   : > { %v2065_v58 = vunpack.c.h.bf16 %v2038_v44  ;;  %v461_v60 = vadd.f32 %v433_v50, %v432_v47  ;;  %v430_v61 = vmul.f32 %v2052_v52, %v2052_v52  ;;  %v431_v62 = vmul.f32 %v2055_v53, %v2055_v53 }
 0x138   : > { %v454_v55 = vadd.f32 %v453_v46, %v428_v41  ;;  %v2074_v63 = vunpack.c.l.bf16 %v2045_v49  ;;  %v438_v15 = vmul.f32 %v2062_v57, %v2062_v57  ;;  %v2081_v17 = vunpack.c.l.bf16 %v2057_v54 }
 0x139   : > { %447 = vadd.xlane.f32.xlu0 %v446_v45  ;;  %v439_v16 = vmul.f32 %v2065_v58, %v2065_v58  ;;  %v2084_v18 = vunpack.c.h.bf16 %v2057_v54  ;;  %v462_v21 = vadd.f32 %v461_v60, %v434_v51  ;;  %v457_v22 = vadd.f32 %v430_v61, %v429_v56 }
 0x13a   : > { %455 = vadd.xlane.f32.xlu1 %v454_v55  ;;  %v440_v24 = vmul.f32 %v2074_v63, %v2074_v63  ;;  %v2089_v25 = vunpack.c.l.bf16 %v2067_v59  ;;  %v435_v30 = vmul.f32 %v2081_v17, %v2081_v17  ;;  %v514_v41 = vld [vmem:[#allocation2 + $0x8] sm:$0xff]  ;;  %v515_v45 = vld [vmem:[#allocation2 + $0x10] sm:$0xff] }
 0x13b   : > { %v469_v26 = vadd.f32 %v439_v16, %v438_v15  ;;  %v436_v31 = vmul.f32 %v2084_v18, %v2084_v18  ;;  %v458_v35 = vadd.f32 %v457_v22, %v431_v62  ;;  %563 = vmatprep.mubr.bf16.mxu0 %v514_v41  ;;  %1299 = vmatprep.mubr.bf16.mxu1 %v515_v45 }
 0x13c   : > { %v437_v36 = vmul.f32 %v2089_v25, %v2089_v25 }
 0x13d   : > { %v465_v37 = vadd.f32 %v436_v31, %v435_v30  ;;  %459 = vadd.xlane.f32.xlu0 %v458_v35  ;;  %v470_v38 = vadd.f32 %v469_v26, %v440_v24 }
 0x13e   : > { %463 = vadd.xlane.f32.xlu1 %v462_v21 }
 0x13f   : > { %v466_v40 = vadd.f32 %v465_v37, %v437_v36 }
 0x141   : > { %467 = vadd.xlane.f32.xlu0 %v466_v40 }
 0x142   : > { %471 = vadd.xlane.f32.xlu1 %v470_v38 }
 0x1c2   : > { %v444_v46 = vpop.xlane.xlu0 %443 }
 0x1c3   : > { %v473_v47 = vmax.f32 %v444_v46, 1e-24  ;;  %v452_v50 = vpop.xlane.xlu1 %451 }
 0x1c4   : > { %v475_v51 = vmax.f32 %v452_v50, 1e-24 }
 0x1c5   : > { %1418 = vrsqrt.f32 %v473_v47 }
 0x1c6   : > { %1420 = vrsqrt.f32 %v475_v51  ;;  %v448_v55 = vpop.xlane.xlu0 %447 }
 0x1c7   : > { %v474_v56 = vmax.f32 %v448_v55, 1e-24  ;;  %v456_v60 = vpop.xlane.xlu1 %455 }
 0x1c8   : > { %v476_v61 = vmax.f32 %v456_v60, 1e-24 }
 0x1c9   : > { %1422 = vrsqrt.f32 %v474_v56 }
 0x1ca   : > { %1424 = vrsqrt.f32 %v476_v61  ;;  %v460_v15 = vpop.xlane.xlu0 %459 }
 0x1cb   : > { %v464_v62 = vpop.xlane.xlu1 %463  ;;  %v477_v21 = vmax.f32 %v460_v15, 1e-24 }
 0x1cc   : > { %v478_v16 = vmax.f32 %v464_v62, 1e-24 }
 0x1ce   : > { %1426 = vrsqrt.f32 %v478_v16  ;;  %v468_v26 = vpop.xlane.xlu0 %467 }
 0x1cf   : > { %v1419_v22 = vpop.eup %1418  ;;  %1428 = vrsqrt.f32 %v477_v21  ;;  %v472_v24 = vpop.xlane.xlu1 %471  ;;  %v479_v35 = vmax.f32 %v468_v26, 1e-24 }
 0x1d0   : > { %v1421_v30 = vpop.eup %1420  ;;  %v480_v31 = vmax.f32 %v472_v24, 1e-24  ;;  %v490_v36 = vmul.f32 %v1419_v22, %v1955_v4  ;;  %v491_v38 = vmul.f32 %v1419_v22, %v1958_v5  ;;  %v489_v40 = vmul.f32 %v1419_v22, %v1952_v3 }
 0x1d1   : > { %v496_v41 = vmul.f32 %v1421_v30, %v1970_v10  ;;  %v497_v45 = vmul.f32 %v1421_v30, %v1973_v11 }
 0x1d2   : > { %1430 = vrsqrt.f32 %v480_v31 }
 0x1d3   : > { %v1423_v37 = vpop.eup %1422  ;;  %1432 = vrsqrt.f32 %v479_v35 }
 0x1d4   : > { %v1425_v46 = vpop.eup %1424  ;;  %v493_v47 = vmul.f32 %v1423_v37, %v1979_v13  ;;  %v494_v50 = vmul.f32 %v1423_v37, %v2000_v23  ;;  %v492_v51 = vmul.f32 %v1423_v37, %v1976_v12 }
 0x1d5   : > { %v499_v55 = vmul.f32 %v1425_v46, %v2010_v28  ;;  %v500_v4 = vmul.f32 %v1425_v46, %v2017_v32  ;;  %v495_v32 = vmul.f32 %v1421_v30, %v1963_v7  ;;  %v498_v62 = vmul.f32 %v1425_v46, %v2007_v27 }
 0x1d6   : > { %v520_v5 = vpack.c.bf16 %v493_v47, %v490_v36  ;;  %v521_v56 = vpack.c.bf16 %v494_v50, %v491_v38  ;;  %v519_v3 = vpack.c.bf16 %v492_v51, %v489_v40  ;;  %v1662_v36 = vmov 0  }
 0x1d7   : > { %v523_v60 = vpack.c.bf16 %v499_v55, %v496_v41  ;;  %v524_v10 = vpack.c.bf16 %v500_v4, %v497_v45  ;;  %v522_v24 = vpack.c.bf16 %v498_v62, %v495_v32  ;;  %1416 = vset.pattern.permute.xlu0 %v1662_v36  ;;  %1417 = vset.pattern.permute.xlu1 %v1662_v36 }
 0x1d8   : > { %v1427_v61 = vpop.eup %1426  ;;  %531 = vmatprep.subr.bf16.mxu0 %v520_v5  ;;  %1291 = vmatprep.subr.bf16.mxu1 %v521_v56 }
 0x1d9   : > { %v1429_v11 = vpop.eup %1428  ;;  %532 = vmatpush1.bf16.xpose.msra.mxu0 %v519_v3  ;;  %1292 = vmatpush3.bf16.xpose.msra.mxu1 %v521_v56  ;;  %v505_v13 = vmul.f32 %v1427_v61, %v2033_v42  ;;  %v506_v28 = vmul.f32 %v1427_v61, %v2036_v43  ;;  %v504_v26 = vmul.f32 %v1427_v61, %v2020_v33 }
 0x1da   : > { %533 = vmatprep.subr.bf16.mxu0 %v523_v60  ;;  %1293 = vmatprep.subr.bf16.mxu1 %v524_v10  ;;  %v502_v12 = vmul.f32 %v1429_v11, %v2052_v52  ;;  %v503_v23 = vmul.f32 %v1429_v11, %v2055_v53  ;;  %v501_v42 = vmul.f32 %v1429_v11, %v2043_v48 }
 0x1dc   : > { %v1431_v15 = vpop.eup %1430  ;;  %v526_v16 = vpack.c.bf16 %v505_v13, %v502_v12  ;;  %v527_v21 = vpack.c.bf16 %v506_v28, %v503_v23  ;;  %v525_v53 = vpack.c.bf16 %v504_v26, %v501_v42 }
 0x1dd   : > { %v1433_v22 = vpop.eup %1432  ;;  %v511_v52 = vmul.f32 %v1431_v15, %v2065_v58  ;;  %v512_v27 = vmul.f32 %v1431_v15, %v2074_v63  ;;  %v510_v48 = vmul.f32 %v1431_v15, %v2062_v57  ;;  %v513_v58 = vld [vmem:[#allocation2] sm:$0xff]  ;;  %v516_v63 = vld [vmem:[#allocation2 + $0x18] sm:$0xff] }
 0x1de   : > { %v508_v43 = vmul.f32 %v1433_v22, %v2084_v18  ;;  %v509_v7 = vmul.f32 %v1433_v22, %v2089_v25  ;;  %v507_v35 = vmul.f32 %v1433_v22, %v2081_v17  ;;  %v518_v18 = vld [vmem:[#allocation2 + $0x28] sm:$0xff]  ;;  %v517_v25 = vld [vmem:[#allocation2 + $0x20] sm:$0xff]  ;;  %v629_v57 = vld [vmem:[%s1911_s18] sm:$0xff] }
 0x1df   : > { %vm630_vm1 = vnez %v629_v57 }
 0x1e0   : > { %v529_v30 = vpack.c.bf16 %v511_v52, %v508_v43  ;;  %v530_v31 = vpack.c.bf16 %v512_v27, %v509_v7  ;;  %v528_v33 = vpack.c.bf16 %v510_v48, %v507_v35  ;;  %v631_v17 = vsel %vm630_vm1, 16843009, %v1662_v36 }
 0x1e1   : > { %534 = vmatpush1.bf16.xpose.msra.mxu0 %v522_v24  ;;  %1294 = vmatpush3.bf16.xpose.msra.mxu1 %v524_v10  ;;  %v632_v37 = vunpack.c.0.s8 %v631_v17  ;;  %v633_v38 = vunpack.c.1.s8 %v631_v17  ;;  %v634_v45 = vunpack.c.2.s8 %v631_v17  ;;  %v635_v47 = vunpack.c.3.s8 %v631_v17  ;;  %v2146_v17 = vld [vmem:[#allocation3 + $0x8] sm:$0xff] }
 0x1e2   : > { %535 = vmatprep.subr.bf16.mxu0 %v526_v16  ;;  %1295 = vmatprep.subr.bf16.mxu1 %v527_v21 }
 0x1e3   : > { %v636_v40 = vpack.c.b16 %v632_v37, %v632_v37  ;;  %v638_v41 = vpack.c.b16 %v633_v38, %v633_v38  ;;  %v640_v51 = vpack.c.b16 %v634_v45, %v634_v45  ;;  %v642_v55 = vpack.c.b16 %v635_v47, %v635_v47 }
 0x1e4   : > { %v1259_v45 = vcombine.high %v1945_v0, %v1965_v8 }
 0x1e5   : > { %v637_v46 = vpack.c.b8 %v636_v40, %v636_v40  ;;  %v639_v50 = vpack.c.b8 %v638_v41, %v638_v41  ;;  %v641_v5 = vpack.c.b8 %v640_v51, %v640_v51  ;;  %v643_v3 = vpack.c.b8 %v642_v55, %v642_v55 }
 0x1e6   : > { %v1258_v51 = vcombine.low %v1945_v0, %v1965_v8 }
 0x1e7   : > { %vm644_vm2 = vnez %v637_v46  ;;  %vm645_vm3 = vnez %v639_v50  ;;  %vm646_vm4 = vnez %v641_v5  ;;  %vm647_vm5 = vnez %v643_v3  ;;  %v2159_v50 = vld [vmem:[#allocation3 + $0x10] sm:$0xff] }
 0x1e8   : > { %v648_v4 = vsel %vm644_vm2, 16843009, %v1662_v36  ;;  %v649_v56 = vsel %vm645_vm3, 16843009, %v1662_v36  ;;  %v650_v23 = vsel %vm646_vm4, 16843009, %v1662_v36 }
 0x1e9   : > { %536 = vmatpush1.bf16.xpose.msra.mxu0 %v525_v53  ;;  %1296 = vmatpush3.bf16.xpose.msra.mxu1 %v527_v21  ;;  %v652_v60 = vunpack.c.0.s8 %v648_v4  ;;  %v653_v10 = vunpack.c.0.s8 %v649_v56  ;;  %v651_v21 = vsel %vm647_vm5, 16843009, %v1662_v36  ;;  %v654_v42 = vunpack.c.0.s8 %v650_v23  ;;  %v2163_v4 = vld [vmem:[#allocation3 + $0x18] sm:$0xff] }
 0x1ea   : > { %537 = vmatprep.subr.bf16.mxu0 %v529_v30  ;;  %1297 = vmatprep.subr.bf16.mxu1 %v530_v31  ;;  %v655_v43 = vunpack.c.0.s8 %v651_v21  ;;  %v1262_v56 = vcombine.high %v1949_v2, %v1981_v14 }
 0x1eb   : > { %vm656_vm6 = vcmp.ne.s32.totalorder %v652_v60, 0  ;;  %vm657_vm8 = vcmp.ne.s32.totalorder %v653_v10, 0  ;;  %vm658_vm9 = vcmp.ne.s32.totalorder %v654_v42, 0  ;;  %v1261_v60 = vcombine.low %v1949_v2, %v1981_v14 }
 0x1ec   : > { %vm659_vm10 = vcmp.ne.s32.totalorder %v655_v43, 0  ;;  %v1264_v2 = vcombine.low %v2022_v34, %v1993_v20  ;;  %v1260_v14 = vcombine.low %v1947_v1, %v1967_v9  ;;  %v1266_v1 = vcombine.low %v2028_v39, %v2012_v29 }
 0x1ed   : > { %v1269_v9 = vcombine.low %v2067_v59, %v2045_v49 }
 0x1f1   : > { %538 = vmatpush1.bf16.xpose.msra.mxu0 %v528_v33  ;;  %1298 = vmatpush3.bf16.xpose.msra.mxu1 %v530_v31 }
 0x1f2   : > { %874 = vmatprep.subr.bf16.mxu0 %v1259_v45  ;;  %1303 = vmatprep.subr.bf16.mxu1 %v1260_v14  ;;  %v746_v45 = vld [vmem:[#allocation4 + $0x18] sm:$0xff] }
 0x1f8   : > { %564 = vmatmul.mubr.bf16.vlgmr.msra.gmra.mrb[0].mxu0 %v513_v58  ;;  %1300 = vmatmul.mubr.bf16.vlgmr.msra.gmra.mrb[0].mxu1 %v518_v18 }
 0x1f9   : > { %571 = vmatprep.mubr.bf16.mxu0 %v517_v25  ;;  %875 = vmatpush1.bf16.msra.mxu0 %v1258_v51 }
 0x1fa   : > { %876 = vmatprep.subr.bf16.mxu0 %v1262_v56  ;;  %1304 = vmatpush3.bf16.msra.mxu1 %v1260_v14 }
 0x1fd   : > { %877 = vmatpush1.bf16.msra.mxu0 %v1261_v60 }
 0x200   : > { %572 = vmatmul.mubr.bf16.gmra.mrb[4].mxu0 %v516_v63  ;;  %v664_v63 = vld [vmem:[#allocation3] sm:$0xff] }
 0x201   : > { %906 = vmatprep.mubr.bf16.mxu0 %v1662_v36 }
 0x2cb   : > { %v565_v61 = vpop.f32.mrb[0].mxu0  ;;  %v1301_v11 = vpop.f32.mrb[0].mxu1 }
 0x2cc   : > { %v567_v13 = vpop.f32.mrb[1].mxu0  ;;  %v614_v12 = vpop.f32.mrb[1].mxu1 }
 0x2cd   : > { %v615_v28 = vadd.f32 %v614_v12, %v565_v61  ;;  %v568_v32 = vpop.f32.mrb[2].mxu0  ;;  %v1302_v62 = vpop.f32.mrb[2].mxu1  ;;  %v1265_v61 = vcombine.high %v2022_v34, %v1993_v20  ;;  %v1267_v12 = vcombine.low %v2057_v54, %v2038_v44  ;;  %v1263_v20 = vcombine.low %v1960_v6, %v1991_v19 }
 0x2ce   : > { %v570_v15 = vpop.f32.mrb[3].mxu0  ;;  %v617_v16 = vpop.f32.mrb[3].mxu1 }
 0x2cf   : > { %v618_v22 = vadd.f32 %v617_v16, %v568_v32  ;;  %v2130_v24 = vsel %vm656_vm6, %v615_v28, -1e+30  ;;  %878 = vmatprep.subr.bf16.mxu0 %v1265_v61  ;;  %1305 = vmatprep.subr.bf16.mxu1 %v1263_v20 }
 0x2d0   : > { %v669_v26 = vsel %vm668_vm7, %v2130_v24, -inf  ;;  %879 = vmatpush1.bf16.msra.mxu0 %v1264_v2  ;;  %1306 = vmatpush3.bf16.msra.mxu1 %v1263_v20 }
 0x2d1   : > { %670 = vmax.xlane.f32.xlu0 %v669_v26  ;;  %v2134_v52 = vsel %vm657_vm8, %v618_v22, -1e+30  ;;  %1307 = vmatprep.subr.bf16.mxu1 %v1266_v1 }
 0x2d2   : > { %v672_v7 = vsel %vm668_vm7, %v2134_v52, -inf }
 0x2d3   : > { %673 = vmax.xlane.f32.xlu1 %v672_v7  ;;  %v573_v27 = vpop.f32.mrb[4].mxu0 }
 0x2d4   : > { %v623_v53 = vadd.f32 %v1301_v11, %v573_v27  ;;  %v575_v30 = vpop.f32.mrb[5].mxu0  ;;  %v1268_v11 = vcombine.high %v2057_v54, %v2038_v44  ;;  %1308 = vmatpush3.bf16.msra.mxu1 %v1266_v1 }
 0x2d5   : > { %v576_v31 = vpop.f32.mrb[6].mxu0  ;;  %1309 = vmatprep.subr.bf16.mxu1 %v1269_v9 }
 0x2d6   : > { %v626_v35 = vadd.f32 %v1302_v62, %v576_v31  ;;  %v578_v48 = vpop.f32.mrb[7].mxu0  ;;  %v2138_v33 = vsel %vm658_vm9, %v623_v53, -1e+30  ;;  %880 = vmatprep.subr.bf16.mxu0 %v1268_v11 }
 0x2d7   : > { %v675_v58 = vsel %vm668_vm7, %v2138_v33, -inf  ;;  %881 = vmatpush1.bf16.msra.mxu0 %v1267_v12  ;;  %v743_v48 = vld [vmem:[#allocation4] sm:$0xff] }
 0x2d8   : > { %676 = vmax.xlane.f32.xlu0 %v675_v58  ;;  %v2142_v18 = vsel %vm659_vm10, %v626_v35, -1e+30  ;;  %1310 = vmatpush3.bf16.msra.mxu1 %v1269_v9  ;;  %v766_v9 = vld [vmem:[#allocation5 + $0x30] sm:$0xff] }
 0x2d9   : > { %v678_v25 = vsel %vm668_vm7, %v2142_v18, -inf }
 0x2da   : > { %679 = vmax.xlane.f32.xlu1 %v678_v25 }
 0x35e   : > { %v671_v57 = vpop.xlane.xlu0 %670 }
 0x35f   : > { %v681_v37 = vmax.f32 %v664_v63, %v671_v57 }
 0x360   : > { %v674_v38 = vpop.xlane.xlu1 %673 }
 0x361   : > { %v685_v40 = vsub.f32 %v664_v63, %v681_v37  ;;  %1000 = vst.msk [vmem:[#allocation3] sm:$0xff] %vm350_vm0, %v681_v37  ;;  %v2150_v41 = vmax.f32 %v2146_v17, %v674_v38  ;;  %699 = vperm.xlu0 %1416, %v681_v37   ;;  %v745_v38 = vld [vmem:[#allocation4 + $0x10] sm:$0xff] }
 0x363   : > { %v689_v46 = vmul.f32 1.442695, %v685_v40  ;;  %v686_v47 = vsub.f32 %v2146_v17, %v2150_v41  ;;  %1001 = vst.msk [vmem:[#allocation3 + $0x8] sm:$0xff] %vm350_vm0, %v2150_v41  ;;  %704 = vperm.xlu1 %1417, %v2150_v41  }
 0x365   : > { %1434 = vpow2.f32 %v689_v46  ;;  %v677_v55 = vpop.xlane.xlu0 %676 }
 0x366   : > { %v683_v5 = vmax.f32 %v2159_v50, %v677_v55  ;;  %v760_v55 = vld [vmem:[#allocation5] sm:$0xff] }
 0x367   : > { %v680_v3 = vpop.xlane.xlu1 %679 }
 0x368   : > { %v687_v10 = vsub.f32 %v2159_v50, %v683_v5  ;;  %1002 = vst.msk [vmem:[#allocation3 + $0x10] sm:$0xff] %vm350_vm0, %v683_v5  ;;  %v2173_v0 = vmax.f32 %v2163_v4, %v680_v3  ;;  %709 = vperm.xlu1 %1417, %v683_v5   ;;  %v763_v5 = vld [vmem:[#allocation5 + $0x18] sm:$0xff]  ;;  %v764_v3 = vld [vmem:[#allocation5 + $0x20] sm:$0xff] }
 0x36a   : > { %v688_v8 = vsub.f32 %v2163_v4, %v2173_v0  ;;  %1003 = vst.msk [vmem:[#allocation3 + $0x18] sm:$0xff] %vm350_vm0, %v2173_v0  ;;  %v761_v4 = vld [vmem:[#allocation5 + $0x8] sm:$0xff] }
 0x36c   : > { %714 = vperm.xlu1 %1417, %v2173_v0   ;;  %v695_v30 = vmul.f32 1.442695, %v688_v8 }
 0x36f   : > { %v2188_v13 = vpop.eup %1434 }
 0x370   : > { %774 = vperm.xlu1 %1417, %v2188_v13   ;;  %v747_v58 = vmul.f32 %v2188_v13, %v743_v48 }
 0x3e0   : > { %v700_v34 = vpop.permute.xlu0 %699 }
 0x3e1   : > { %v717_v44 = vsub.f32 %v2130_v24, %v700_v34  ;;  %v693_v24 = vmul.f32 1.442695, %v687_v10  ;;  %v768_v34 = vld [vmem:[#allocation5 + $0x40] sm:$0xff] }
 0x3e2   : > { %v705_v6 = vpop.permute.xlu1 %704 }
 0x3e3   : > { %v721_v19 = vmul.f32 1.442695, %v717_v44  ;;  %v718_v54 = vsub.f32 %v2134_v52, %v705_v6  ;;  %v691_v52 = vmul.f32 1.442695, %v686_v47  ;;  %v767_v44 = vld [vmem:[#allocation5 + $0x38] sm:$0xff]  ;;  %v762_v6 = vld [vmem:[#allocation5 + $0x10] sm:$0xff] }
 0x3e5   : > { %1436 = vpow2.f32 %v721_v19  ;;  %v723_v23 = vmul.f32 1.442695, %v718_v54  ;;  %v769_v19 = vld [vmem:[#allocation5 + $0x48] sm:$0xff]  ;;  %v771_v54 = vld [vmem:[#allocation5 + $0x58] sm:$0xff] }
 0x3e7   : > { %1438 = vpow2.f32 %v723_v23  ;;  %v710_v28 = vpop.permute.xlu1 %709 }
 0x3e8   : > { %v719_v29 = vsub.f32 %v2138_v33, %v710_v28  ;;  %v744_v33 = vld [vmem:[#allocation4 + $0x8] sm:$0xff] }
 0x3e9   : > { %v765_v28 = vld [vmem:[#allocation5 + $0x28] sm:$0xff] }
 0x3ea   : > { %v725_v39 = vmul.f32 1.442695, %v719_v29  ;;  %v770_v29 = vld [vmem:[#allocation5 + $0x50] sm:$0xff] }
 0x3eb   : > { %v715_v32 = vpop.permute.xlu1 %714 }
 0x3ec   : > { %v720_v49 = vsub.f32 %v2142_v18, %v715_v32  ;;  %1440 = vpow2.f32 %v725_v39 }
 0x3ee   : > { %v727_v59 = vmul.f32 1.442695, %v720_v49 }
 0x3ef   : > { %v1437_v62 = vpop.eup %1436  ;;  %v775_v35 = vpop.permute.xlu1 %774 }
 0x3f0   : > { %1442 = vpow2.f32 %v727_v59  ;;  %v731_v15 = vsel %vm668_vm7, %v1437_v62, 0.0  ;;  %v792_v60 = vmul.f32 %v775_v35, %v760_v55  ;;  %v793_v0 = vmul.f32 %v775_v35, %v761_v4 }
 0x3f1   : > { %v1439_v16 = vpop.eup %1438  ;;  %732 = vadd.xlane.f32.xlu1 %v731_v15  ;;  %1444 = vpow2.f32 %v693_v24  ;;  %v794_v15 = vmul.f32 %v775_v35, %v762_v6 }
 0x3f2   : > { %v729_v21 = vpack.c.bf16 %v1439_v16, %v1437_v62  ;;  %v734_v22 = vsel %vm668_vm7, %v1439_v16, 0.0  ;;  %1446 = vpow2.f32 %v691_v52 }
 0x3f3   : > { %735 = vadd.xlane.f32.xlu0 %v734_v22  ;;  %1448 = vpow2.f32 %v695_v30 }
 0x3f4   : > { %1270 = vmatmul.mubr.msk.bf16.vlgmr.msra.gmra.mrb[8].mxu0 %vm668_vm7, %v729_v21  ;;  %1311 = vmatprep.mubr.msk.bf16.mxu1 %vm668_vm7, %v729_v21 }
 0x3f5   : > { %916 = vmatprep.mubr.bf16.mxu0 %v1662_v36 }
 0x3f6   : > { %v1441_v42 = vpop.eup %1440 }
 0x3f7   : > { %v737_v53 = vsel %vm668_vm7, %v1441_v42, 0.0 }
 0x3fa   : > { %v1443_v26 = vpop.eup %1442 }
 0x3fb   : > { %v730_v43 = vpack.c.bf16 %v1443_v26, %v1441_v42  ;;  %v1445_v7 = vpop.eup %1444  ;;  %v740_v36 = vsel %vm668_vm7, %v1443_v26, 0.0 }
 0x3fc   : > { %v1447_v27 = vpop.eup %1446  ;;  %v749_v40 = vmul.f32 %v1445_v7, %v745_v38 }
 0x3fd   : > { %1271 = vmatmul.mubr.msk.bf16.gmra.mrb[12].mxu0 %vm668_vm7, %v730_v43  ;;  %1312 = vmatmul.mubr.msk.bf16.vlgmr.msra.gmra.mrb[4].mxu1 %vm668_vm7, %v730_v43  ;;  %v1449_v31 = vpop.eup %1448  ;;  %v748_v63 = vmul.f32 %v1447_v27, %v744_v33 }
 0x3fe   : > { %v750_v47 = vmul.f32 %v1449_v31, %v746_v45 }
 0x402   : > { %784 = vperm.xlu1 %1417, %v1445_v7  }
 0x409   : > { %779 = vperm.xlu0 %1416, %v1447_v27  }
 0x426   : > { %738 = vadd.xlane.f32.xlu1 %v737_v53 }
 0x42a   : > { %741 = vadd.xlane.f32.xlu1 %v740_v36 }
 0x43b   : > { %789 = vperm.xlu1 %1417, %v1449_v31  }
 0x47e   : > { %v733_v18 = vpop.xlane.xlu1 %732 }
 0x47f   : > { %v751_v25 = vadd.f32 %v747_v58, %v733_v18 }
 0x480   : > { %v736_v57 = vpop.xlane.xlu0 %735 }
 0x481   : > { %756 = vst.msk [vmem:[#allocation4] sm:$0xff] %vm350_vm0, %v751_v25  ;;  %v752_v17 = vadd.f32 %v748_v63, %v736_v57 }
 0x482   : > { %v785_v37 = vpop.permute.xlu1 %784 }
 0x483   : > { %757 = vst.msk [vmem:[#allocation4 + $0x8] sm:$0xff] %vm350_vm0, %v752_v17  ;;  %v798_v39 = vmul.f32 %v785_v37, %v766_v9  ;;  %v800_v32 = vmul.f32 %v785_v37, %v768_v34  ;;  %v799_v62 = vmul.f32 %v785_v37, %v767_v44 }
 0x488   : > { %v780_v56 = vpop.permute.xlu0 %779 }
 0x489   : > { %v795_v8 = vmul.f32 %v780_v56, %v763_v5  ;;  %v796_v14 = vmul.f32 %v780_v56, %v764_v3  ;;  %v797_v52 = vmul.f32 %v780_v56, %v765_v28 }
 0x4b3   : > { %v739_v41 = vpop.xlane.xlu1 %738 }
 0x4b4   : > { %v753_v46 = vadd.f32 %v749_v40, %v739_v41 }
 0x4b6   : > { %758 = vst.msk [vmem:[#allocation4 + $0x10] sm:$0xff] %vm350_vm0, %v753_v46 }
 0x4b7   : > { %v742_v50 = vpop.xlane.xlu1 %741 }
 0x4b8   : > { %v754_v51 = vadd.f32 %v750_v47, %v742_v50 }
 0x4ba   : > { %759 = vst.msk [vmem:[#allocation4 + $0x18] sm:$0xff] %vm350_vm0, %v754_v51 }
 0x4bb   : > { %v790_v23 = vpop.permute.xlu1 %789 }
 0x4bc   : > { %v801_v16 = vmul.f32 %v790_v23, %v769_v19  ;;  %v803_v21 = vmul.f32 %v790_v23, %v771_v54  ;;  %v802_v43 = vmul.f32 %v790_v23, %v770_v29 }
 0x4c7   : > { %v908_v10 = vpop.f32.mrb[8].mxu0 }
 0x4c8   : > { %v976_v61 = vadd.f32 %v908_v10, %v792_v60  ;;  %v910_v2 = vpop.f32.mrb[9].mxu0 }
 0x4c9   : > { %v977_v11 = vadd.f32 %v910_v2, %v793_v0  ;;  %v912_v13 = vpop.f32.mrb[10].mxu0 }
 0x4ca   : > { %988 = vst [vmem:[#allocation5] sm:$0xff] %v976_v61  ;;  %v979_v12 = vadd.f32 %v912_v13, %v795_v8  ;;  %v914_v20 = vpop.f32.mrb[11].mxu0 }
 0x4cb   : > { %989 = vst [vmem:[#allocation5 + $0x8] sm:$0xff] %v977_v11  ;;  %v980_v1 = vadd.f32 %v914_v20, %v796_v14 }
 0x4cc   : > { %991 = vst [vmem:[#allocation5 + $0x18] sm:$0xff] %v979_v12 }
 0x4cd   : > { %992 = vst [vmem:[#allocation5 + $0x20] sm:$0xff] %v980_v1 }
 0x4d0   : > { %v918_v49 = vpop.f32.mrb[12].mxu0  ;;  %v1313_v59 = vpop.f32.mrb[4].mxu1 }
 0x4d1   : > { %v982_v22 = vadd.f32 %v918_v49, %v798_v39  ;;  %v984_v24 = vadd.f32 %v1313_v59, %v800_v32  ;;  %v920_v42 = vpop.f32.mrb[13].mxu0  ;;  %v961_v26 = vpop.f32.mrb[5].mxu1 }
 0x4d2   : > { %v983_v7 = vadd.f32 %v920_v42, %v799_v62  ;;  %v978_v27 = vadd.f32 %v961_v26, %v794_v15  ;;  %v922_v53 = vpop.f32.mrb[14].mxu0  ;;  %v1314_v36 = vpop.f32.mrb[6].mxu1 }
 0x4d3   : > { %994 = vst [vmem:[#allocation5 + $0x30] sm:$0xff] %v982_v22  ;;  %996 = vst [vmem:[#allocation5 + $0x40] sm:$0xff] %v984_v24  ;;  %v985_v30 = vadd.f32 %v922_v53, %v801_v16  ;;  %v987_v31 = vadd.f32 %v1314_v36, %v803_v21  ;;  %v924_v48 = vpop.f32.mrb[15].mxu0  ;;  %v964_v33 = vpop.f32.mrb[7].mxu1 }
 0x4d4   : > { %995 = vst [vmem:[#allocation5 + $0x38] sm:$0xff] %v983_v7  ;;  %990 = vst [vmem:[#allocation5 + $0x10] sm:$0xff] %v978_v27  ;;  %v986_v35 = vadd.f32 %v924_v48, %v802_v43  ;;  %v981_v58 = vadd.f32 %v964_v33, %v797_v52 }
 0x4d5   : > { %997 = vst [vmem:[#allocation5 + $0x48] sm:$0xff] %v985_v30  ;;  %999 = vst [vmem:[#allocation5 + $0x58] sm:$0xff] %v987_v31 }
 0x4d6   : > { %998 = vst [vmem:[#allocation5 + $0x50] sm:$0xff] %v986_v35  ;;  %993 = vst [vmem:[#allocation5 + $0x28] sm:$0xff] %v981_v58 }
 0x4d7 PF: > { %v1008_v18 = vld [vmem:[#allocation3 + $0x8] sm:$0xff]  ;;  %v1007_v25 = vld [vmem:[#allocation3] sm:$0xff]  ;;  %v1017_v63 = vld [vmem:[#allocation4 + $0x10] sm:$0xff]  ;;  %v1663_v57 = vmov 0   ;;  %s1318_s20 = smul.u32 1536, %s1642_s28  ;;  %s1130_s9 = sshll.u32 %s1942_s19, 4  ;;  %s2239_s9 = int_to_ptr.vmem [resolvable:$true] %s1130_s9 }
 0x4d8   : > { %1451 = vset.pattern.permute.xlu1 %v1663_v57  ;;  %1450 = vset.pattern.permute.xlu0 %v1663_v57  ;;  %vm1012_vm11 = vcmp.gt.f32.partialorder %v1008_v18, -5e+29  ;;  %vm1011_vm12 = vcmp.gt.f32.partialorder %v1007_v25, -5e+29  ;;  %v1021_v17 = vmax.f32 %v1017_v63, 1e-30 }
 0x4d9   : > { %v1072_v37 = vsel %vm1012_vm11, 1, %v1663_v57  ;;  %v1071_v38 = vsel %vm1011_vm12, 1, %v1663_v57  ;;  %v1015_v40 = vld [vmem:[#allocation4] sm:$0xff]  ;;  %v1018_v41 = vld [vmem:[#allocation4 + $0x18] sm:$0xff]  ;;  %v1016_v45 = vld [vmem:[#allocation4 + $0x8] sm:$0xff]  ;;  %s2237_s6 = scalar_lea.hbm %s2298_s4, %s1318_s20  ;;  %s1116_s7 = scalar_lea.sflag [#allocation10], %s1895_s11 }
 0x4da   : > { %1079 = vperm.xlu1 %1451, %v1072_v37   ;;  %1076 = vperm.xlu0 %1450, %v1071_v38   ;;  %1452 = vrcp.f32 %v1021_v17  ;;  %v1019_v46 = vmax.f32 %v1015_v40, 1e-30  ;;  %v1022_v47 = vmax.f32 %v1018_v41, 1e-30  ;;  %v1020_v50 = vmax.f32 %v1016_v45, 1e-30 }
 0x4db   : > { %v1010_v55 = vld [vmem:[#allocation3 + $0x18] sm:$0xff]  ;;  %v1009_v5 = vld [vmem:[#allocation3 + $0x10] sm:$0xff]  ;;  %v1027_v2 = vld [vmem:[#allocation5] sm:$0xff]  ;;  %s1558_s23 = scalar_lea.vmem %s2239_s9, 1536  ;;  %p2323_p4 = scmp.ne.s32.totalorder %s2312_s14, 0 }
 0x4dc   : > { %1454 = vrcp.f32 %v1019_v46  ;;  %vm1014_vm13 = vcmp.gt.f32.partialorder %v1010_v55, -5e+29  ;;  %vm1013_vm14 = vcmp.gt.f32.partialorder %v1009_v5, -5e+29  ;;  %v1028_v14 = vld [vmem:[#allocation5 + $0x8] sm:$0xff]  ;;  %v1029_v11 = vld [vmem:[#allocation5 + $0x10] sm:$0xff]  ;;  %p1559_p8 = scmp.ne.s32.totalorder %s2239_s9, %s1558_s23 }
 0x4dd   : > { %1456 = vrcp.f32 %v1022_v47  ;;  %v1074_v60 = vsel %vm1014_vm13, 1, %v1663_v57  ;;  %v1073_v10 = vsel %vm1013_vm14, 1, %v1663_v57  ;;  %v1033_v12 = vld [vmem:[#allocation5 + $0x30] sm:$0xff]  ;;  %v1034_v20 = vld [vmem:[#allocation5 + $0x38] sm:$0xff]  ;;  %v1031_v19 = vld [vmem:[#allocation5 + $0x20] sm:$0xff]  ;;  %s1664_s22 = smov [#allocation14]  }
 0x4de   : > { %1458 = vrcp.f32 %v1020_v50  ;;  %v1030_v6 = vld [vmem:[#allocation5 + $0x18] sm:$0xff]  ;;  %v1032_v54 = vld [vmem:[#allocation5 + $0x28] sm:$0xff]  ;;  %v1037_v32 = vld [vmem:[#allocation5 + $0x50] sm:$0xff]  ;;  %p1560_p1 = pnand %p1559_p8, %p2323_p4  ;;  %s1562_s5 = sshll.u32 %s1664_s22, 4  ;;  %s1563_s5 = int_to_ptr.vmem [resolvable:$false] %s1562_s5 }
 0x4df   : > { %v1036_v39 = vld [vmem:[#allocation5 + $0x48] sm:$0xff]  ;;  %v1038_v49 = vld [vmem:[#allocation5 + $0x58] sm:$0xff]  ;;  %v1035_v62 = vld [vmem:[#allocation5 + $0x40] sm:$0xff]  ;;  %s1564_s1 = scalar_lea.vmem %s1563_s5, 3072  ;;  %p1565_p12 = scmp.lt.s32.totalorder %s2239_s9, %s1563_s5 }
 0x4e0   : > { %p1561_p3 = pneg %p1560_p1  ;;  %p1566_p9 = scmp.lt.s32.totalorder %s1564_s1, %s1558_s23 }
 0x4e2   : > { %p1567_p11 = por %p1566_p9, %p1565_p12 }
 0x4e4   : > { %v1453_v51 = vpop.eup %1452  ;;  %p1568_p13 = pnand %p1567_p11, %p1561_p3 }
 0x4e5   : > { %1051 = vperm.xlu1 %1451, %v1453_v51  }
 0x4e6   : > { %v1455_v4 = vpop.eup %1454 }
 0x4e7   : > { %v1457_v56 = vpop.eup %1456  ;;  %1041 = vperm.xlu0 %1450, %v1455_v4  }
 0x4e8   : > { %v1459_v3 = vpop.eup %1458 }
 0x4e9   : > { %1056 = vperm.xlu1 %1451, %v1457_v56  }
 0x4eb   : > { %1046 = vperm.xlu0 %1450, %v1459_v3  }
 0x4ed   : > { %1085 = vperm.xlu1 %1451, %v1074_v60  }
 0x4ef   : > { %1082 = vperm.xlu0 %1450, %v1073_v10  }
 0x559   : > { %v1080_v0 = vpop.permute.xlu1 %1079  ;;  %v1077_v8 = vpop.permute.xlu0 %1076 }
 0x55a   : > { %vm1087_vm15 = vcmp.eq.s32.totalorder %v1077_v8, 1  ;;  %vm1088_vm0 = vcmp.eq.s32.totalorder %v1080_v0, 1 }
 0x564   : > { %v1052_v61 = vpop.permute.xlu1 %1051 }
 0x565   : > { %v1065_v15 = vmul.f32 %v1052_v61, %v1033_v12  ;;  %v1066_v24 = vmul.f32 %v1052_v61, %v1034_v20  ;;  %v1067_v36 = vmul.f32 %v1052_v61, %v1035_v62 }
 0x566   : > { %v1042_v13 = vpop.permute.xlu0 %1041 }
 0x567   : > { %v1059_v1 = vmul.f32 %v1042_v13, %v1027_v2  ;;  %v1060_v9 = vmul.f32 %v1042_v13, %v1028_v14  ;;  %v1061_v34 = vmul.f32 %v1042_v13, %v1029_v11 }
 0x568   : > { %v1057_v44 = vpop.permute.xlu1 %1056 }
 0x569   : > { %v1091_v23 = vsel %vm1087_vm15, %v1059_v1, 0.0  ;;  %v1092_v28 = vsel %vm1087_vm15, %v1060_v9, 0.0  ;;  %v1093_v29 = vsel %vm1087_vm15, %v1061_v34, 0.0  ;;  %v1068_v42 = vmul.f32 %v1057_v44, %v1036_v39 }
 0x56a   : > { %1103 = vst [vmem:[%s1942_s19] sm:$0xff] %v1091_v23  ;;  %1104 = vst [vmem:[%s1942_s19 + $0x8] sm:$0xff] %v1092_v28  ;;  %v1047_v59 = vpop.permute.xlu0 %1046  ;;  %v1069_v26 = vmul.f32 %v1057_v44, %v1037_v32  ;;  %v1070_v52 = vmul.f32 %v1057_v44, %v1038_v49 }
 0x56b   : > { %1105 = vst [vmem:[%s1942_s19 + $0x10] sm:$0xff] %v1093_v29  ;;  %v1062_v16 = vmul.f32 %v1047_v59, %v1030_v6  ;;  %v1063_v21 = vmul.f32 %v1047_v59, %v1031_v19  ;;  %v1064_v22 = vmul.f32 %v1047_v59, %v1032_v54 }
 0x56c   : > { %v1086_v43 = vpop.permute.xlu1 %1085 }
 0x56d   : > { %v1094_v7 = vsel %vm1088_vm0, %v1062_v16, 0.0  ;;  %v1095_v27 = vsel %vm1088_vm0, %v1063_v21, 0.0  ;;  %v1096_v53 = vsel %vm1088_vm0, %v1064_v22, 0.0  ;;  %vm1090_vm1 = vcmp.eq.s32.totalorder %v1086_v43, 1 }
 0x56e   : > { %1106 = vst [vmem:[%s1942_s19 + $0x18] sm:$0xff] %v1094_v7  ;;  %1107 = vst [vmem:[%s1942_s19 + $0x20] sm:$0xff] %v1095_v27  ;;  %v1100_v30 = vsel %vm1090_vm1, %v1068_v42, 0.0  ;;  %v1101_v31 = vsel %vm1090_vm1, %v1069_v26, 0.0  ;;  %v1102_v48 = vsel %vm1090_vm1, %v1070_v52, 0.0  ;;  %v1083_v33 = vpop.permute.xlu0 %1082 }
 0x56f   : > { %1108 = vst [vmem:[%s1942_s19 + $0x28] sm:$0xff] %v1096_v53  ;;  %1112 = vst [vmem:[%s1942_s19 + $0x48] sm:$0xff] %v1100_v30  ;;  %vm1089_vm2 = vcmp.eq.s32.totalorder %v1083_v33, 1 }
 0x570   : > { %1113 = vst [vmem:[%s1942_s19 + $0x50] sm:$0xff] %v1101_v31  ;;  %1114 = vst [vmem:[%s1942_s19 + $0x58] sm:$0xff] %v1102_v48  ;;  %v1097_v35 = vsel %vm1089_vm2, %v1065_v15, 0.0  ;;  %v1098_v58 = vsel %vm1089_vm2, %v1066_v24, 0.0  ;;  %v1099_v18 = vsel %vm1089_vm2, %v1067_v36, 0.0 }
 0x571   : > { %1109 = vst [vmem:[%s1942_s19 + $0x30] sm:$0xff] %v1097_v35  ;;  %1110 = vst [vmem:[%s1942_s19 + $0x38] sm:$0xff] %v1098_v58 }
 0x572   : > { %1111 = vst [vmem:[%s1942_s19 + $0x40] sm:$0xff] %v1099_v18 }
 0x573   : > { %1571 = shalt.err (!%p1568_p13)
}
 0x574   : > { %s1572_s0 = scalar_lea.hbm %s2237_s6, 1536  ;;  %s1576_s21 = scalar_lea.hbm %s2298_s4, 3072 }
 0x575   : > { %p1573_p2 = scmp.ne.s32.totalorder %s2237_s6, %s1572_s0  ;;  %p1577_p0 = scmp.lt.u32.totalorder %s2237_s6, %s2298_s4 }
 0x576   : > { %p1578_p5 = scmp.lt.u32.totalorder %s1576_s21, %s1572_s0  ;;  %p1580_p8 = scmp.lt.u32.totalorder %s1572_s0, %s2237_s6 }
 0x577   : > { %p1574_p10 = pnand %p1573_p2, %p2323_p4 }
 0x578   : > { %p1579_p7 = por %p1578_p5, %p1577_p0 }
 0x579   : > { %p1575_p6 = pneg %p1574_p10 }
 0x57a   : > { %p1581_p1 = por %p1580_p8, %p1579_p7 }
 0x57c   : > { %p1582_p3 = pnand %p1581_p1, %p1575_p6 }
 0x57e   : > { %1585 = shalt.err (!%p1582_p3)
}
 0x57f   : > { %s1665_s18 = smov 384   ;;  %s1666_s13 = smov 24  }
 0x580   : > { %1327 = dma.vmem_to_hbm [thread:$0]  (%p2323_p4), %s2239_s9, 1536, %s2237_s6, %s1116_s7, %s1665_s18, %s1665_s18, %s1666_s13  }
 0x581 PF: > { %s1145_s19 = sand.u32 1, %s1630_s25   ;;  %p2324_p12 = scmp.ne.s32.totalorder %s2313_s17, 0 }
 0x582   : > { %p2325_p9 = scmp.ge.s32.totalorder %s1650_s30, 2  ;;  %s1146_s20 = scalar_lea.sflag [#allocation10], %s1145_s19 }
 0x584   : > { %p1341_p11 = pnand %p2325_p9, %p2324_p12 }
 0x586   : > { %1625 = dma.done.wait (!%p1341_p11), %s1146_s20, 1536  }
 0x587   : > { %1627 = vsyncadd (!%p1341_p11), %s1146_s20, 4294965760  ;;  %s25_s30 = sadd.s32 1, %s1650_s30   ;;  %s2326_s14 = sld [smem:[#allocation20_spill]] }
 0x588   : > { %p22_p13 = scmp.ge.s32.totalorder %s25_s30, 4   ;;  %s2327_s25 = smov %s1634_s26 }
 0x589   : > { %s2328_s26 = smov %s1638_s27  ;;  %s2329_s27 = smov %s1752_s10 }
 0x58a   : > { %s2330_s28 = smov %s1646_s29  ;;  %24 = sbr.rel (!%p22_p13) target bundleno = 19 (0x13), region = 105 }
 0x58d   : > { %s2331_s29 = smov %s2326_s14 }
 0x591   :  { %1151 = vsyncpa [#allocation9], 1 }
 0x592   :  { %1153 = vsyncpa [#allocation9 + $0x1], 1 }
 0x593   :  { %1154 = vsyncpa [#allocation12], 1 }
 0x594   :  { %1155 = vsyncpa [#allocation10], 1 }
 0x595   :  { %1157 = vsyncpa [#allocation10 + $0x1], 1 }

</bundles_post_ra>
